<compile_context>
chip_gen: v7x
topology: tpu7x:2x2x1
jax: 0.10.0
libtpu: 0.0.40
codegen_flags: <defaults>
</compile_context>

<pallas_src>
import jax
import jax.numpy as jnp
from jax import lax
from jax.experimental import pallas as pl
from jax.experimental.pallas import tpu as pltpu


def _custom_clip_kernel(x_ref, w1_ref, s1_ref, w2_ref, b2_ref, out_ref):
    # Cast the activation tile to the MXU/stream dtype in-register (no separate
    # wrapper-level astype pass over HBM).
    x = x_ref[...].astype(w1_ref.dtype)
    # conv1x1 #1 with BatchNorm + bias pre-folded into (W1', shift1):
    #   h = relu(x @ W1' + shift1)         (MXU, f32 accumulation; VPU relu)
    h = jnp.dot(x, w1_ref[...], preferred_element_type=jnp.float32)
    h = jnp.maximum(h + s1_ref[...], 0.0)
    # conv1x1 #2 (MXU, f32 accumulation).
    y = jnp.dot(h.astype(w2_ref.dtype), w2_ref[...],
                preferred_element_type=jnp.float32)
    y = y + b2_ref[...]
    # L2-normalize along the feature axis (XLU reduce + EUP rsqrt).
    ss = jnp.sum(y * y, axis=-1, keepdims=True)
    out_ref[...] = (y * lax.rsqrt(ss)).astype(out_ref.dtype)


def _pick_batch_tile(B, block_b):
    """Pick the batch tile.

    Rules (in priority order):
      * legal: multiple of 8, or equal to the full batch dim;
      * avoid pad/slice: prefer a tile that divides B exactly;
      * fill the MXU in M: prefer tiles >= 256 when B allows;
      * give v7x megacore >= 2 grid steps for B >= 512.
    """
    if B <= block_b:
        if B >= 512 and B % 16 == 0:
            return B // 2          # two >=256-row blocks -> both v7x TCs busy
        return B                   # one full-batch block (always a legal shape)
    # B > block_b: largest exact divisor of B that is a multiple of 8, >= 256.
    for tb in range(block_b, 255, -8):
        if B % tb == 0:
            return tb
    return block_b                 # rare fallback: pad the last block


def custom_clip_forward(image_features, w1, b1, bn_gamma, bn_beta, bn_mean, bn_var,
                        w2, b2, logit_scale, *, eps=1e-5, block_b=512,
                        compute_dtype=jnp.bfloat16, out_dtype=jnp.bfloat16):
    """Pallas implementation of CustomCLIP.forward (post image-encoder part).

    image_features: (B, 512) output of the frozen CLIP image encoder (any dtype;
    cast to bf16 inside the kernel). Returns (l2-normalized (B, 768) features in
    `out_dtype`, exp(logit_scale)).
    """
    B, d_in = image_features.shape
    d_hid = w1.shape[1]
    d_out = w2.shape[1]

    # Fold BatchNorm2d (eval mode, running stats) and the first conv bias into
    # the first weight/bias (frozen weights -> a one-time host-side transform):
    #   W1'    = W1 * bn_scale[None, :]
    #   shift1 = b1 * bn_scale + bn_shift
    bn_scale = bn_gamma.astype(jnp.float32) * lax.rsqrt(bn_var.astype(jnp.float32) + eps)
    bn_shift = bn_beta.astype(jnp.float32) - bn_mean.astype(jnp.float32) * bn_scale
    w1f = (w1.astype(jnp.float32) * bn_scale[None, :]).astype(compute_dtype)
    s1 = (b1.astype(jnp.float32) * bn_scale + bn_shift).reshape(1, d_hid)
    w2c = w2.astype(compute_dtype)
    b2r = b2.astype(jnp.float32).reshape(1, d_out)

    tb = _pick_batch_tile(B, block_b)
    nb = pl.cdiv(B, tb)
    bp = nb * tb

    # Activations go in as-is (native dtype, no extra HBM round trip); pad only
    # in the rare case the chosen tile does not divide B.
    x = image_features
    if bp != B:
        x = jnp.pad(x, ((0, bp - B), (0, 0)))

    out = pl.pallas_call(
        _custom_clip_kernel,
        out_shape=jax.ShapeDtypeStruct((bp, d_out), out_dtype),
        grid_spec=pltpu.PrefetchScalarGridSpec(
            num_scalar_prefetch=0,
            grid=(nb,),
            in_specs=[
                # Activations: one batch block per grid step (lane-dense, 512 cols).
                pl.BlockSpec((tb, d_in), lambda i: (i, 0)),
                # Folded weights / bias: constant block index -> fetched once,
                # VMEM-resident across all grid steps (~2 MiB total in bf16).
                pl.BlockSpec((d_in, d_hid), lambda i: (0, 0)),
                pl.BlockSpec((1, d_hid), lambda i: (0, 0)),
                pl.BlockSpec((d_hid, d_out), lambda i: (0, 0)),
                pl.BlockSpec((1, d_out), lambda i: (0, 0)),
            ],
            out_specs=pl.BlockSpec((tb, d_out), lambda i: (i, 0)),
        ),
        compiler_params=pltpu.CompilerParams(
            dimension_semantics=("parallel",),
            # Footprint at tb=512: double-buffered x (2 MiB f32) + out (1.5 MiB
            # bf16) tiles, resident weights ~2 MiB (x2 buffers), f32 h/y staging
            # ~3 MiB -> comfortably under 32 MiB on v5e/v6e/v7x.
            vmem_limit_bytes=32 * 1024 * 1024,
        ),
    )(x, w1f, s1, w2c, b2r)

    if bp != B:
        # Padded rows may contain junk (rsqrt of a tiny norm); slice them off.
        out = out[:B]

    # logit_scale.exp(): trivial scalar; computed outside the kernel.
    return out, jnp.exp(logit_scale)


if __name__ == "__main__":
    # Module-implied shapes: CLIP ViT-B/16 image features (512) -> VPT_image_trans (768).
    B, D_IN, D_HID, D_OUT = 8, 512, 768, 768
    eps = 1e-5

    key = jax.random.PRNGKey(0)
    ks = jax.random.split(key, 9)

    # TODO(synk): clip_model.visual (frozen CLIP ViT image encoder) is a full
    # transformer with no compact Pallas equivalent here; the kernel consumes its
    # precomputed 512-d output features as input.
    img_feat = jax.random.normal(ks[0], (B, D_IN), jnp.float32)

    # VPT_image_trans parameters (Conv1x1 weights stored as (in, out) dense matrices).
    w1 = 0.02 * jax.random.normal(ks[1], (D_IN, D_HID), jnp.float32)
    b1 = 0.02 * jax.random.normal(ks[2], (D_HID,), jnp.float32)
    bn_gamma = 1.0 + 0.1 * jax.random.normal(ks[3], (D_HID,), jnp.float32)
    bn_beta = 0.1 * jax.random.normal(ks[4], (D_HID,), jnp.float32)
    bn_mean = 0.1 * jax.random.normal(ks[5], (D_HID,), jnp.float32)
    bn_var = jnp.abs(1.0 + 0.1 * jax.random.normal(ks[6], (D_HID,), jnp.float32))
    w2 = 0.02 * jax.random.normal(ks[7], (D_HID, D_OUT), jnp.float32)
    b2 = 0.02 * jax.random.normal(ks[8], (D_OUT,), jnp.float32)
    logit_scale = jnp.asarray(jnp.log(1.0 / 0.07), dtype=jnp.float32)  # CLIP init

    feats, scale = custom_clip_forward(
        img_feat, w1, b1, bn_gamma, bn_beta, bn_mean, bn_var, w2, b2, logit_scale,
        eps=eps)
    feats = jax.block_until_ready(feats)
    scale = jax.block_until_ready(scale)

    # Pure-JAX f32 reference (BatchNorm in eval / running-stats mode).
    h = img_feat @ w1 + b1
    h = (h - bn_mean) / jnp.sqrt(bn_var + eps) * bn_gamma + bn_beta
    h = jnp.maximum(h, 0.0)
    y = h @ w2 + b2
    ref = y / jnp.linalg.norm(y, axis=-1, keepdims=True)

    assert feats.shape == (B, D_OUT)
    err = float(jnp.max(jnp.abs(feats.astype(jnp.float32) - ref)))
    assert jnp.allclose(feats.astype(jnp.float32), ref, atol=2e-2, rtol=2e-2), err
    assert jnp.allclose(scale, jnp.exp(logit_scale)), "logit_scale mismatch"

    print("KERNEL_OK")
</pallas_src>

<mosaic_0001>
module attributes {stable_mosaic.version = 11 : i64} {
  func.func @_custom_clip_kernel(%arg0: i32, %arg1: memref<8x512xf32, #tpu.memory_space<vmem>>, %arg2: memref<512x768xbf16, #tpu.memory_space<vmem>>, %arg3: memref<1x768xf32, #tpu.memory_space<vmem>>, %arg4: memref<768x768xbf16, #tpu.memory_space<vmem>>, %arg5: memref<1x768xf32, #tpu.memory_space<vmem>>, %arg6: memref<8x768xbf16, #tpu.memory_space<vmem>>) attributes {dimension_semantics = [#tpu.dimension_semantics<parallel>], iteration_bounds = array<i64: 1>, scalar_prefetch = 0 : i64, scratch_operands = 0 : i64, tpu.core_type = #tpu.core_type<tc>, window_params = [{transform_indices = @transform_0, window_bounds = array<i64: 8, 512>}, {pipeline_mode = #tpu.pipeline_mode<synchronous>, transform_indices = @transform_1, window_bounds = array<i64: 512, 768>}, {pipeline_mode = #tpu.pipeline_mode<synchronous>, transform_indices = @transform_2, window_bounds = array<i64: 1, 768>}, {pipeline_mode = #tpu.pipeline_mode<synchronous>, transform_indices = @transform_3, window_bounds = array<i64: 768, 768>}, {pipeline_mode = #tpu.pipeline_mode<synchronous>, transform_indices = @transform_4, window_bounds = array<i64: 1, 768>}, {transform_indices = @transform_5, window_bounds = array<i64: 8, 768>}]} {
    %c0 = arith.constant 0 : index
    %c0_0 = arith.constant 0 : index
    %0 = vector.load %arg1[%c0, %c0_0] : memref<8x512xf32, #tpu.memory_space<vmem>>, vector<8x512xf32>
    %1 = arith.truncf %0 : vector<8x512xf32> to vector<8x512xbf16>
    %c0_1 = arith.constant 0 : index
    %c0_2 = arith.constant 0 : index
    %2 = vector.load %arg2[%c0_1, %c0_2] : memref<512x768xbf16, #tpu.memory_space<vmem>>, vector<512x768xbf16>
    %cst = arith.constant dense<0.000000e+00> : vector<8x768xf32>
    %3 = tpu.matmul %1, %2, %cst {dimension_numbers = #tpu.dot_dimension_numbers<[1], [0], [0], [1], [0, 0, 1, 1], [], []>} : vector<8x512xbf16>, vector<512x768xbf16>, vector<8x768xf32> -> vector<8x768xf32>
    %c0_3 = arith.constant 0 : index
    %c0_4 = arith.constant 0 : index
    %4 = vector.load %arg3[%c0_3, %c0_4] : memref<1x768xf32, #tpu.memory_space<vmem>>, vector<1x768xf32>
    %5 = vector.broadcast %4 : vector<1x768xf32> to vector<8x768xf32>
    %6 = arith.addf %3, %5 : vector<8x768xf32>
    %cst_5 = arith.constant 0.000000e+00 : f32
    %7 = vector.broadcast %cst_5 : f32 to vector<8x768xf32>
    %8 = arith.maximumf %6, %7 : vector<8x768xf32>
    %9 = arith.truncf %8 : vector<8x768xf32> to vector<8x768xbf16>
    %c0_6 = arith.constant 0 : index
    %c0_7 = arith.constant 0 : index
    %10 = vector.load %arg4[%c0_6, %c0_7] : memref<768x768xbf16, #tpu.memory_space<vmem>>, vector<768x768xbf16>
    %cst_8 = arith.constant dense<0.000000e+00> : vector<8x768xf32>
    %11 = tpu.matmul %9, %10, %cst_8 {dimension_numbers = #tpu.dot_dimension_numbers<[1], [0], [0], [1], [0, 0, 1, 1], [], []>} : vector<8x768xbf16>, vector<768x768xbf16>, vector<8x768xf32> -> vector<8x768xf32>
    %c0_9 = arith.constant 0 : index
    %c0_10 = arith.constant 0 : index
    %12 = vector.load %arg5[%c0_9, %c0_10] : memref<1x768xf32, #tpu.memory_space<vmem>>, vector<1x768xf32>
    %13 = vector.broadcast %12 : vector<1x768xf32> to vector<8x768xf32>
    %14 = arith.addf %11, %13 : vector<8x768xf32>
    %15 = arith.mulf %14, %14 : vector<8x768xf32>
    %cst_11 = arith.constant dense<0.000000e+00> : vector<8xf32>
    %16 = vector.multi_reduction <add>, %15, %cst_11 [1] : vector<8x768xf32> to vector<8xf32>
    %17 = vector.shape_cast %16 : vector<8xf32> to vector<8x1xf32>
    %18 = math.rsqrt %17 : vector<8x1xf32>
    %19 = vector.broadcast %18 : vector<8x1xf32> to vector<8x768xf32>
    %20 = arith.mulf %14, %19 : vector<8x768xf32>
    %21 = arith.truncf %20 : vector<8x768xf32> to vector<8x768xbf16>
    %c0_12 = arith.constant 0 : index
    %c0_13 = arith.constant 0 : index
    %22 = vector.load %arg6[%c0_12, %c0_13] : memref<8x768xbf16, #tpu.memory_space<vmem>>, vector<8x768xbf16>
    tpu.vector_store %arg6[%c0_12, %c0_13], %21 {strides = array<i32>} : memref<8x768xbf16, #tpu.memory_space<vmem>>, vector<8x768xbf16>,
    return
  }
  func.func @transform_0(%arg0: i32) -> (i32, i32) {
    %c0_i32 = arith.constant 0 : i32
    %c0_i32_0 = arith.constant 0 : i32
    return %arg0, %c0_i32 : i32, i32
  }
  func.func @transform_1(%arg0: i32) -> (i32, i32) {
    %c0_i32 = arith.constant 0 : i32
    %c0_i32_0 = arith.constant 0 : i32
    %c0_i32_1 = arith.constant 0 : i32
    return %c0_i32, %c0_i32_0 : i32, i32
  }
  func.func @transform_2(%arg0: i32) -> (i32, i32) {
    %c0_i32 = arith.constant 0 : i32
    %c0_i32_0 = arith.constant 0 : i32
    %c0_i32_1 = arith.constant 0 : i32
    return %c0_i32, %c0_i32_0 : i32, i32
  }
  func.func @transform_3(%arg0: i32) -> (i32, i32) {
    %c0_i32 = arith.constant 0 : i32
    %c0_i32_0 = arith.constant 0 : i32
    %c0_i32_1 = arith.constant 0 : i32
    return %c0_i32, %c0_i32_0 : i32, i32
  }
  func.func @transform_4(%arg0: i32) -> (i32, i32) {
    %c0_i32 = arith.constant 0 : i32
    %c0_i32_0 = arith.constant 0 : i32
    %c0_i32_1 = arith.constant 0 : i32
    return %c0_i32, %c0_i32_0 : i32, i32
  }
  func.func @transform_5(%arg0: i32) -> (i32, i32) {
    %c0_i32 = arith.constant 0 : i32
    %c0_i32_0 = arith.constant 0 : i32
    return %arg0, %c0_i32 : i32, i32
  }
}

</mosaic_0001>

<bundles_post_ra>
// kernel: tpu_custom_call.1
= control target key start
LH: loop header
LB: loop body
LE: loop exit
PB: predicated region body
PF: predicated region fallthrough
CT: control target
= control target key end

     0   :  { %10 = vsyncpa [#allocation3], 0  ;;  %s5333_s0 = inlined_call_operand.hbm [shape: f32[8,512], index: 0, kind: input, shape index: {}]   ;;  %s5334_s1 = inlined_call_operand.hbm [shape: bf16[512,768], index: 1, kind: input, shape index: {}]   ;;  %s5335_s2 = inlined_call_operand.hbm [shape: f32[1,768], index: 2, kind: input, shape index: {}]   ;;  %s5336_s3 = inlined_call_operand.hbm [shape: bf16[768,768], index: 3, kind: input, shape index: {}]   ;;  %s5337_s4 = inlined_call_operand.hbm [shape: f32[1,768], index: 4, kind: input, shape index: {}]   ;;  %s5338_s5 = inlined_call_operand.hbm [shape: bf16[8,768], index: 5, kind: output, shape index: {}]  }
   0x1   :  { %11 = vsyncpa [#allocation6], 0 }
   0x2   :  { %12 = vsyncpa [#allocation9], 0 }
   0x3   :  { %13 = vsyncpa [#allocation4], 0  ;;  %s5130_s18 = smov [#allocation5]   ;;  %s4990_s22 = scalar_lea.hbm %s5334_s1, 24576 }
   0x4   :  { %s29_s19 = sshll.u32 %s5130_s18, 4  ;;  %p4991_p0 = scmp.ne.s32.totalorder %s5334_s1, %s4990_s22  ;;  %s30_s19 = int_to_ptr.vmem [resolvable:$true] %s29_s19 }
   0x5   :  { %p4994_p1 = scmp.lt.u32.totalorder %s4990_s22, %s5334_s1 }
   0x7   :  { %p4996_p2 = pnand %p4994_p1, %p4991_p0 }
   0x9   :  { %4999 = shalt.err (!%p4996_p2)
}
   0xa   :  { %s5000_s27 = scalar_lea.vmem %s30_s19, 24576  ;;  %p5005_p4 = scmp.lt.s32.totalorder %s30_s19, %s30_s19 }
   0xb   :  { %p5001_p3 = scmp.ne.s32.totalorder %s30_s19, %s5000_s27  ;;  %p5006_p5 = scmp.lt.s32.totalorder %s5000_s27, %s5000_s27 }
   0xd   :  { %p5007_p6 = por %p5006_p5, %p5005_p4 }
   0xf   :  { %p5008_p7 = pnand %p5007_p6, %p5001_p3 }
  0x11   :  { %5011 = shalt.err (!%p5008_p7)
}
  0x12   :  { %s5131_s28 = smov 384   ;;  %s5132_s29 = smov 24  }
  0x13   :  { %35 = dma.hbm_to_vmem [thread:$0]  %s5334_s1, 24576, %s30_s19, [#allocation6], %s5131_s28, %s5131_s28, %s5132_s29  }
  0x14   :  { %s5133_s7 = smov [#allocation8]   ;;  %s5134_s9 = smov [#allocation2]  }
  0x15   :  { %s51_s8 = sshll.u32 %s5133_s7, 4  ;;  %s20_s10 = sshll.u32 %s5134_s9, 4  ;;  %s52_s8 = int_to_ptr.vmem [resolvable:$true] %s51_s8  ;;  %s21_s10 = int_to_ptr.vmem [resolvable:$true] %s20_s10 }
  0x16   :  { %s5012_s13 = scalar_lea.hbm %s5336_s3, 36864 }
  0x17   :  { %p5013_p8 = scmp.ne.s32.totalorder %s5336_s3, %s5012_s13  ;;  %p5016_p9 = scmp.lt.u32.totalorder %s5012_s13, %s5336_s3 }
  0x19   :  { %p5018_p10 = pnand %p5016_p9, %p5013_p8 }
  0x1b   :  { %5021 = shalt.err (!%p5018_p10)
}
  0x1c   :  { %s5022_s1 = scalar_lea.vmem %s52_s8, 36864  ;;  %p5027_p12 = scmp.lt.s32.totalorder %s52_s8, %s52_s8 }
  0x1d   :  { %p5023_p11 = scmp.ne.s32.totalorder %s52_s8, %s5022_s1  ;;  %p5028_p13 = scmp.lt.s32.totalorder %s5022_s1, %s5022_s1 }
  0x1f   :  { %p5029_p0 = por %p5028_p13, %p5027_p12 }
  0x21   :  { %p5030_p1 = pnand %p5029_p0, %p5023_p11 }
  0x23   :  { %5033 = shalt.err (!%p5030_p1)
}
  0x24   :  { %57 = dma.hbm_to_vmem [thread:$0]  %s5336_s3, 36864, %s52_s8, [#allocation9], %s5131_s28, %s5131_s28, %s5132_s29  }
  0x25   :  { %s5034_s22 = scalar_lea.hbm %s5333_s0, 512 }
  0x26   :  { %p5035_p2 = scmp.ne.s32.totalorder %s5333_s0, %s5034_s22  ;;  %p5038_p3 = scmp.lt.u32.totalorder %s5034_s22, %s5333_s0 }
  0x28   :  { %p5040_p4 = pnand %p5038_p3, %p5035_p2 }
  0x2a   :  { %5043 = shalt.err (!%p5040_p4)
}
  0x2b   :  { %s5044_s27 = scalar_lea.vmem %s21_s10, 512  ;;  %p5049_p6 = scmp.lt.s32.totalorder %s21_s10, %s21_s10 }
  0x2c   :  { %p5045_p5 = scmp.ne.s32.totalorder %s21_s10, %s5044_s27  ;;  %p5050_p7 = scmp.lt.s32.totalorder %s5044_s27, %s5044_s27 }
  0x2e   :  { %p5051_p8 = por %p5050_p7, %p5049_p6 }
  0x30   :  { %p5052_p9 = pnand %p5051_p8, %p5045_p5 }
  0x32   :  { %5055 = shalt.err (!%p5052_p9)
}
  0x33   :  { %23 = dma.hbm_to_vmem [thread:$0]  %s5333_s0, 512, %s21_s10, [#allocation3]  }
  0x34   :  { %s5135_s29 = smov [#allocation7]   ;;  %s5136_s6 = smov [#allocation10]  }
  0x35   :  { %s42_s30 = sshll.u32 %s5135_s29, 4  ;;  %s64_s7 = sshll.u32 %s5136_s6, 4  ;;  %s43_s30 = int_to_ptr.vmem [resolvable:$true] %s42_s30  ;;  %s65_s7 = int_to_ptr.vmem [resolvable:$true] %s64_s7 }
  0x36   :  { %s5056_s11 = scalar_lea.hbm %s5335_s2, 96 }
  0x37   :  { %p5057_p10 = scmp.ne.s32.totalorder %s5335_s2, %s5056_s11  ;;  %p5060_p11 = scmp.lt.u32.totalorder %s5056_s11, %s5335_s2 }
  0x39   :  { %p5062_p12 = pnand %p5060_p11, %p5057_p10 }
  0x3b   :  { %5065 = shalt.err (!%p5062_p12)
}
  0x3c   :  { %s5066_s0 = scalar_lea.vmem %s43_s30, 96  ;;  %p5071_p0 = scmp.lt.s32.totalorder %s43_s30, %s43_s30 }
  0x3d   :  { %p5067_p13 = scmp.ne.s32.totalorder %s43_s30, %s5066_s0  ;;  %p5072_p1 = scmp.lt.s32.totalorder %s5066_s0, %s5066_s0 }
  0x3f   :  { %p5073_p2 = por %p5072_p1, %p5071_p0 }
  0x41   :  { %p5074_p3 = pnand %p5073_p2, %p5067_p13 }
  0x43   :  { %5077 = shalt.err (!%p5074_p3)
}
  0x44   :  { %45 = dma.hbm_to_vmem [thread:$0]  %s5335_s2, 96, %s43_s30, [#allocation6]  }
  0x45   :  { %s5078_s18 = scalar_lea.hbm %s5337_s4, 96 }
  0x46   :  { %p5079_p4 = scmp.ne.s32.totalorder %s5337_s4, %s5078_s18  ;;  %p5082_p5 = scmp.lt.u32.totalorder %s5078_s18, %s5337_s4 }
  0x48   :  { %p5084_p6 = pnand %p5082_p5, %p5079_p4 }
  0x4a   :  { %5087 = shalt.err (!%p5084_p6)
}
  0x4b   :  { %s5088_s23 = scalar_lea.vmem %s65_s7, 96  ;;  %p5093_p8 = scmp.lt.s32.totalorder %s65_s7, %s65_s7 }
  0x4c   :  { %p5089_p7 = scmp.ne.s32.totalorder %s65_s7, %s5088_s23  ;;  %p5094_p9 = scmp.lt.s32.totalorder %s5088_s23, %s5088_s23 }
  0x4e   :  { %p5095_p10 = por %p5094_p9, %p5093_p8 }
  0x50   :  { %p5096_p11 = pnand %p5095_p10, %p5089_p7 }
  0x52   :  { %5099 = shalt.err (!%p5096_p11)
}
  0x53   :  { %67 = dma.hbm_to_vmem [thread:$0]  %s5337_s4, 96, %s65_s7, [#allocation9]  }
  0x54   :  { %5122 = dma.done.wait [#allocation3], 512  }
  0x55   :  { %5123 = vsyncadd [#allocation3], 4294966784 }
  0x56   :  { %5124 = dma.done.wait [#allocation6], 24672  }
  0x57   :  { %5125 = vsyncadd [#allocation6], 4294942624 }
  0x58   :  { %5126 = dma.done.wait [#allocation9], 36960  }
  0x59   :  { %5127 = vsyncadd [#allocation9], 4294930336  ;;  %v4268_v0 = vld [vmem:[#allocation5 + $0x4] ss:$24 sps:$4 sm:$0xff]   ;;  %v4272_v2 = vld [vmem:[#allocation5] ss:$24 sps:$4 sm:$0xff]  }
  0x5a   :  { %v4270_v1 = vld [vmem:[#allocation5 + $0xc] ss:$24 sps:$4 sm:$0xff]   ;;  %1275 = vmatprep.subr.bf16.mxu0 %v4268_v0  ;;  %v4273_v3 = vld [vmem:[#allocation5 + $0x8] ss:$24 sps:$4 sm:$0xff]   ;;  %v4276_v5 = vld [vmem:[#allocation5 + $0x3c] ss:$24 sps:$4 sm:$0xff]  }
  0x5b   :  { %1357 = vmatprep.subr.bf16.mxu1 %v4270_v1  ;;  %v4274_v4 = vld [vmem:[#allocation5 + $0x34] ss:$24 sps:$4 sm:$0xff]   ;;  %1276 = vmatpush1.bf16.msra.mxu0 %v4272_v2  ;;  %v4278_v6 = vld [vmem:[#allocation5 + $0x30] ss:$24 sps:$4 sm:$0xff]   ;;  %v4280_v8 = vld [vmem:[#allocation5 + $0x64] ss:$24 sps:$4 sm:$0xff]  }
  0x5c   :  { %1358 = vmatpush1.bf16.msra.mxu1 %v4273_v3  ;;  %1277 = vmatprep.subr.bf16.mxu0 %v4274_v4  ;;  %v4279_v7 = vld [vmem:[#allocation5 + $0x38] ss:$24 sps:$4 sm:$0xff]   ;;  %v4282_v9 = vld [vmem:[#allocation5 + $0x6c] ss:$24 sps:$4 sm:$0xff]   ;;  %v4285_v11 = vld [vmem:[#allocation5 + $0x68] ss:$24 sps:$4 sm:$0xff]  }
  0x5d   :  { %1359 = vmatprep.subr.bf16.mxu1 %v4276_v5  ;;  %v4284_v10 = vld [vmem:[#allocation5 + $0x60] ss:$24 sps:$4 sm:$0xff]   ;;  %v4286_v12 = vld [vmem:[#allocation5 + $0x94] ss:$24 sps:$4 sm:$0xff]   ;;  %v4290_v14 = vld [vmem:[#allocation5 + $0x90] ss:$24 sps:$4 sm:$0xff]  }
  0x5e   :  { %v4288_v13 = vld [vmem:[#allocation5 + $0x9c] ss:$24 sps:$4 sm:$0xff]   ;;  %v4291_v15 = vld [vmem:[#allocation5 + $0x98] ss:$24 sps:$4 sm:$0xff]   ;;  %v4294_v17 = vld [vmem:[#allocation5 + $0xcc] ss:$24 sps:$4 sm:$0xff]  }
  0x5f   :  { %1278 = vmatpush1.bf16.msra.mxu0 %v4278_v6  ;;  %v4292_v16 = vld [vmem:[#allocation5 + $0xc4] ss:$24 sps:$4 sm:$0xff]   ;;  %v4296_v18 = vld [vmem:[#allocation5 + $0xc0] ss:$24 sps:$4 sm:$0xff]   ;;  %v4298_v20 = vld [vmem:[#allocation5 + $0xf4] ss:$24 sps:$4 sm:$0xff]  }
  0x60   :  { %1360 = vmatpush1.bf16.msra.mxu1 %v4279_v7  ;;  %1279 = vmatprep.subr.bf16.mxu0 %v4280_v8  ;;  %v4297_v19 = vld [vmem:[#allocation5 + $0xc8] ss:$24 sps:$4 sm:$0xff]   ;;  %v4300_v21 = vld [vmem:[#allocation5 + $0xfc] ss:$24 sps:$4 sm:$0xff]   ;;  %v4303_v23 = vld [vmem:[#allocation5 + $0xf8] ss:$24 sps:$4 sm:$0xff]  }
  0x61   :  { %1361 = vmatprep.subr.bf16.mxu1 %v4282_v9  ;;  %v4302_v22 = vld [vmem:[#allocation5 + $0xf0] ss:$24 sps:$4 sm:$0xff]   ;;  %v4304_v24 = vld [vmem:[#allocation5 + $0x124] ss:$24 sps:$4 sm:$0xff]   ;;  %v4308_v26 = vld [vmem:[#allocation5 + $0x120] ss:$24 sps:$4 sm:$0xff]  }
  0x62   :  { %v4306_v25 = vld [vmem:[#allocation5 + $0x12c] ss:$24 sps:$4 sm:$0xff]   ;;  %v4309_v27 = vld [vmem:[#allocation5 + $0x128] ss:$24 sps:$4 sm:$0xff]   ;;  %v4312_v29 = vld [vmem:[#allocation5 + $0x15c] ss:$24 sps:$4 sm:$0xff]  }
  0x63   :  { %1280 = vmatpush1.bf16.msra.mxu0 %v4284_v10  ;;  %v4310_v28 = vld [vmem:[#allocation5 + $0x154] ss:$24 sps:$4 sm:$0xff]   ;;  %v4314_v30 = vld [vmem:[#allocation5 + $0x150] ss:$24 sps:$4 sm:$0xff]   ;;  %v4316_v32 = vld [vmem:[#allocation5 + $0x184] ss:$24 sps:$4 sm:$0xff]  }
  0x64   :  { %1362 = vmatpush1.bf16.msra.mxu1 %v4285_v11  ;;  %1281 = vmatprep.subr.bf16.mxu0 %v4286_v12  ;;  %v4315_v31 = vld [vmem:[#allocation5 + $0x158] ss:$24 sps:$4 sm:$0xff]   ;;  %v4318_v33 = vld [vmem:[#allocation5 + $0x18c] ss:$24 sps:$4 sm:$0xff]   ;;  %v4321_v35 = vld [vmem:[#allocation5 + $0x188] ss:$24 sps:$4 sm:$0xff]  }
  0x65   :  { %1363 = vmatprep.subr.bf16.mxu1 %v4288_v13  ;;  %v4320_v34 = vld [vmem:[#allocation5 + $0x180] ss:$24 sps:$4 sm:$0xff]   ;;  %v4322_v36 = vld [vmem:[#allocation5 + $0x1b4] ss:$24 sps:$4 sm:$0xff]   ;;  %v4326_v38 = vld [vmem:[#allocation5 + $0x1b0] ss:$24 sps:$4 sm:$0xff]  }
  0x66   :  { %v4324_v37 = vld [vmem:[#allocation5 + $0x1bc] ss:$24 sps:$4 sm:$0xff]   ;;  %v4327_v39 = vld [vmem:[#allocation5 + $0x1b8] ss:$24 sps:$4 sm:$0xff]   ;;  %v4330_v41 = vld [vmem:[#allocation5 + $0x1ec] ss:$24 sps:$4 sm:$0xff]  }
  0x67   :  { %1282 = vmatpush1.bf16.msra.mxu0 %v4290_v14  ;;  %v4328_v40 = vld [vmem:[#allocation5 + $0x1e4] ss:$24 sps:$4 sm:$0xff]   ;;  %v4332_v42 = vld [vmem:[#allocation5 + $0x1e0] ss:$24 sps:$4 sm:$0xff]   ;;  %v4334_v44 = vld [vmem:[#allocation5 + $0x214] ss:$24 sps:$4 sm:$0xff]  }
  0x68   :  { %1364 = vmatpush1.bf16.msra.mxu1 %v4291_v15  ;;  %1283 = vmatprep.subr.bf16.mxu0 %v4292_v16  ;;  %v4333_v43 = vld [vmem:[#allocation5 + $0x1e8] ss:$24 sps:$4 sm:$0xff]   ;;  %v4336_v45 = vld [vmem:[#allocation5 + $0x21c] ss:$24 sps:$4 sm:$0xff]   ;;  %v4339_v49 = vld [vmem:[#allocation5 + $0x218] ss:$24 sps:$4 sm:$0xff]  }
  0x69   :  { %1365 = vmatprep.subr.bf16.mxu1 %v4294_v17  ;;  %v84_v46 = vld [vmem:[#allocation2 + $0x8] sm:$0xff]  ;;  %v4340_v50 = vld [vmem:[#allocation5 + $0x244] ss:$24 sps:$4 sm:$0xff]   ;;  %v4344_v52 = vld [vmem:[#allocation5 + $0x240] ss:$24 sps:$4 sm:$0xff]   ;;  %s5137_s4 = smov [#allocation11]  }
  0x6a   :  { %v4338_v47 = vld [vmem:[#allocation5 + $0x210] ss:$24 sps:$4 sm:$0xff]   ;;  %v5228_v48 = vpack.c.bf16 %v84_v46, %v84_v46  ;;  %v4342_v51 = vld [vmem:[#allocation5 + $0x24c] ss:$24 sps:$4 sm:$0xff]   ;;  %v4348_v55 = vld [vmem:[#allocation5 + $0x27c] ss:$24 sps:$4 sm:$0xff]  }
  0x6b   :  { %1284 = vmatpush1.bf16.msra.mxu0 %v4296_v18  ;;  %v4345_v53 = vld [vmem:[#allocation5 + $0x248] ss:$24 sps:$4 sm:$0xff]   ;;  %v4346_v54 = vld [vmem:[#allocation5 + $0x274] ss:$24 sps:$4 sm:$0xff]   ;;  %v4351_v57 = vld [vmem:[#allocation5 + $0x278] ss:$24 sps:$4 sm:$0xff]  }
  0x6c   :  { %1366 = vmatpush1.bf16.msra.mxu1 %v4297_v19  ;;  %1285 = vmatprep.subr.bf16.mxu0 %v4298_v20  ;;  %v4350_v56 = vld [vmem:[#allocation5 + $0x270] ss:$24 sps:$4 sm:$0xff]   ;;  %v4352_v58 = vld [vmem:[#allocation5 + $0x2a4] ss:$24 sps:$4 sm:$0xff]   ;;  %v4356_v60 = vld [vmem:[#allocation5 + $0x2a0] ss:$24 sps:$4 sm:$0xff]  }
  0x6d   :  { %1367 = vmatprep.subr.bf16.mxu1 %v4300_v21  ;;  %1307 = vmatprep.mubr.bf16.mxu0 %v5228_v48  ;;  %v4354_v59 = vld [vmem:[#allocation5 + $0x2ac] ss:$24 sps:$4 sm:$0xff]   ;;  %v4357_v61 = vld [vmem:[#allocation5 + $0x2a8] ss:$24 sps:$4 sm:$0xff]   ;;  %v4360_v63 = vld [vmem:[#allocation5 + $0x2dc] ss:$24 sps:$4 sm:$0xff]  }
  0x6e   :  { %1389 = vmatprep.mubr.bf16.mxu1 %v5228_v48  ;;  %v4358_v62 = vld [vmem:[#allocation5 + $0x2d4] ss:$24 sps:$4 sm:$0xff]   ;;  %v4362_v0 = vld [vmem:[#allocation5 + $0x2d0] ss:$24 sps:$4 sm:$0xff]   ;;  %v83_v2 = vld [vmem:[#allocation2] sm:$0xff]  ;;  %s3715_s25 = sshll.u32 %s5137_s4, 4  ;;  %s3716_s25 = int_to_ptr.vmem [resolvable:$true] %s3715_s25 }
  0x6f   :  { %1286 = vmatpush1.bf16.msra.mxu0 %v4302_v22  ;;  %v4363_v1 = vld [vmem:[#allocation5 + $0x2d8] ss:$24 sps:$4 sm:$0xff]   ;;  %v4366_v3 = vld [vmem:[#allocation5 + $0x304] ss:$24 sps:$4 sm:$0xff]   ;;  %v5232_v5 = vpack.c.bf16 %v83_v2, %v83_v2  ;;  %v4367_v7 = vld [vmem:[#allocation5 + $0x308] ss:$24 sps:$4 sm:$0xff]   ;;  %p5105_p13 = scmp.lt.s32.totalorder %s3716_s25, %s3716_s25 }
  0x70   :  { %1368 = vmatpush1.bf16.msra.mxu1 %v4303_v23  ;;  %1287 = vmatprep.subr.bf16.mxu0 %v4304_v24  ;;  %v4369_v4 = vld [vmem:[#allocation5 + $0x30c] ss:$24 sps:$4 sm:$0xff]   ;;  %v4364_v6 = vld [vmem:[#allocation5 + $0x300] ss:$24 sps:$4 sm:$0xff]   ;;  %v4375_v9 = vld [vmem:[#allocation5 + $0x33c] ss:$24 sps:$4 sm:$0xff]  }
  0x71   :  { %1369 = vmatprep.subr.bf16.mxu1 %v4306_v25  ;;  %v4372_v8 = vld [vmem:[#allocation5 + $0x334] ss:$24 sps:$4 sm:$0xff]   ;;  %v4370_v10 = vld [vmem:[#allocation5 + $0x330] ss:$24 sps:$4 sm:$0xff]   ;;  %v4378_v12 = vld [vmem:[#allocation5 + $0x364] ss:$24 sps:$4 sm:$0xff]  }
  0x72   :  { %v4373_v11 = vld [vmem:[#allocation5 + $0x338] ss:$24 sps:$4 sm:$0xff]   ;;  %v4381_v13 = vld [vmem:[#allocation5 + $0x36c] ss:$24 sps:$4 sm:$0xff]   ;;  %v4379_v15 = vld [vmem:[#allocation5 + $0x368] ss:$24 sps:$4 sm:$0xff]  }
  0x73   :  { %1288 = vmatpush1.bf16.msra.mxu0 %v4308_v26  ;;  %v4376_v14 = vld [vmem:[#allocation5 + $0x360] ss:$24 sps:$4 sm:$0xff]   ;;  %v4384_v16 = vld [vmem:[#allocation5 + $0x394] ss:$24 sps:$4 sm:$0xff]   ;;  %v4382_v18 = vld [vmem:[#allocation5 + $0x390] ss:$24 sps:$4 sm:$0xff]  }
  0x74   :  { %1370 = vmatpush1.bf16.msra.mxu1 %v4309_v27  ;;  %1289 = vmatprep.subr.bf16.mxu0 %v4310_v28  ;;  %v4387_v17 = vld [vmem:[#allocation5 + $0x39c] ss:$24 sps:$4 sm:$0xff]   ;;  %v4385_v19 = vld [vmem:[#allocation5 + $0x398] ss:$24 sps:$4 sm:$0xff]   ;;  %v4393_v21 = vld [vmem:[#allocation5 + $0x3cc] ss:$24 sps:$4 sm:$0xff]  }
  0x75   :  { %1371 = vmatprep.subr.bf16.mxu1 %v4312_v29  ;;  %v4390_v20 = vld [vmem:[#allocation5 + $0x3c4] ss:$24 sps:$4 sm:$0xff]   ;;  %v4388_v22 = vld [vmem:[#allocation5 + $0x3c0] ss:$24 sps:$4 sm:$0xff]   ;;  %v4396_v24 = vld [vmem:[#allocation5 + $0x3f4] ss:$24 sps:$4 sm:$0xff]  }
  0x76   :  { %v4391_v23 = vld [vmem:[#allocation5 + $0x3c8] ss:$24 sps:$4 sm:$0xff]   ;;  %v4399_v25 = vld [vmem:[#allocation5 + $0x3fc] ss:$24 sps:$4 sm:$0xff]   ;;  %v4397_v27 = vld [vmem:[#allocation5 + $0x3f8] ss:$24 sps:$4 sm:$0xff]  }
  0x77   :  { %1290 = vmatpush1.bf16.msra.mxu0 %v4314_v30  ;;  %v4394_v26 = vld [vmem:[#allocation5 + $0x3f0] ss:$24 sps:$4 sm:$0xff]   ;;  %v4402_v28 = vld [vmem:[#allocation5 + $0x424] ss:$24 sps:$4 sm:$0xff]   ;;  %s5100_s26 = scalar_lea.vmem %s3716_s25, 384 }
  0x78   :  { %1372 = vmatpush1.bf16.msra.mxu1 %v4315_v31  ;;  %1291 = vmatprep.subr.bf16.mxu0 %v4316_v32  ;;  %v4405_v29 = vld [vmem:[#allocation5 + $0x42c] ss:$24 sps:$4 sm:$0xff]   ;;  %v86_v30 = vld [vmem:[#allocation2 + $0x18] sm:$0xff]  ;;  %v4403_v32 = vld [vmem:[#allocation5 + $0x428] ss:$24 sps:$4 sm:$0xff]   ;;  %p5101_p12 = scmp.ne.s32.totalorder %s3716_s25, %s5100_s26  ;;  %p5106_p0 = scmp.lt.s32.totalorder %s5100_s26, %s5100_s26 }
  0x79   :  { %1373 = vmatprep.subr.bf16.mxu1 %v4318_v33  ;;  %v4400_v31 = vld [vmem:[#allocation5 + $0x420] ss:$24 sps:$4 sm:$0xff]   ;;  %v5236_v33 = vpack.c.bf16 %v86_v30, %v86_v30  ;;  %v4426_v46 = vld [vmem:[#allocation5 + $0x4e4] ss:$24 sps:$4 sm:$0xff]  }
  0x7a   :  { %v4451_v2 = vld [vmem:[#allocation5 + $0x5a8] ss:$24 sps:$4 sm:$0xff]   ;;  %p5107_p1 = por %p5106_p0, %p5105_p13 }
  0x7b   :  { %1292 = vmatpush1.bf16.msra.mxu0 %v4320_v34  ;;  %v4408_v34 = vld [vmem:[#allocation5 + $0x454] ss:$24 sps:$4 sm:$0xff]   ;;  %v4475_v30 = vld [vmem:[#allocation5 + $0x100] ss:$24 sps:$4 sm:$0xff]  }
  0x7c   :  { %1374 = vmatpush1.bf16.msra.mxu1 %v4321_v35  ;;  %1293 = vmatprep.subr.bf16.mxu0 %v4322_v36  ;;  %v4411_v35 = vld [vmem:[#allocation5 + $0x45c] ss:$24 sps:$4 sm:$0xff]   ;;  %v4406_v36 = vld [vmem:[#allocation5 + $0x450] ss:$24 sps:$4 sm:$0xff]   ;;  %p5108_p2 = pnand %p5107_p1, %p5101_p12 }
  0x7d   :  { %1375 = vmatprep.subr.bf16.mxu1 %v4324_v37  ;;  %v4409_v37 = vld [vmem:[#allocation5 + $0x458] ss:$24 sps:$4 sm:$0xff]  }
  0x7f   :  { %1294 = vmatpush1.bf16.msra.mxu0 %v4326_v38  ;;  %v4414_v38 = vld [vmem:[#allocation5 + $0x484] ss:$24 sps:$4 sm:$0xff]  }
  0x80   :  { %1376 = vmatpush1.bf16.msra.mxu1 %v4327_v39  ;;  %1295 = vmatprep.subr.bf16.mxu0 %v4328_v40  ;;  %v4417_v39 = vld [vmem:[#allocation5 + $0x48c] ss:$24 sps:$4 sm:$0xff]   ;;  %v4412_v40 = vld [vmem:[#allocation5 + $0x480] ss:$24 sps:$4 sm:$0xff]  }
  0x81   :  { %1377 = vmatprep.subr.bf16.mxu1 %v4330_v41  ;;  %v4415_v41 = vld [vmem:[#allocation5 + $0x488] ss:$24 sps:$4 sm:$0xff]  }
  0x83   :  { %1296 = vmatpush1.bf16.msra.mxu0 %v4332_v42  ;;  %v4420_v42 = vld [vmem:[#allocation5 + $0x4b4] ss:$24 sps:$4 sm:$0xff]  }
  0x84   :  { %1378 = vmatpush1.bf16.msra.mxu1 %v4333_v43  ;;  %1297 = vmatprep.subr.bf16.mxu0 %v4334_v44  ;;  %v4423_v43 = vld [vmem:[#allocation5 + $0x4bc] ss:$24 sps:$4 sm:$0xff]   ;;  %v4418_v44 = vld [vmem:[#allocation5 + $0x4b0] ss:$24 sps:$4 sm:$0xff]  }
  0x85   :  { %1379 = vmatprep.subr.bf16.mxu1 %v4336_v45  ;;  %v4421_v45 = vld [vmem:[#allocation5 + $0x4b8] ss:$24 sps:$4 sm:$0xff]  }
  0x87   :  { %1298 = vmatpush1.bf16.msra.mxu0 %v4338_v47  ;;  %v4429_v47 = vld [vmem:[#allocation5 + $0x4ec] ss:$24 sps:$4 sm:$0xff]  }
  0x88   :  { %1380 = vmatpush1.bf16.msra.mxu1 %v4339_v49  ;;  %1299 = vmatprep.subr.bf16.mxu0 %v4340_v50  ;;  %v4424_v49 = vld [vmem:[#allocation5 + $0x4e0] ss:$24 sps:$4 sm:$0xff]  }
  0x89   :  { %1381 = vmatprep.subr.bf16.mxu1 %v4342_v51  ;;  %v4427_v50 = vld [vmem:[#allocation5 + $0x4e8] ss:$24 sps:$4 sm:$0xff]   ;;  %v4432_v51 = vld [vmem:[#allocation5 + $0x514] ss:$24 sps:$4 sm:$0xff]  }
  0x8b   :  { %1300 = vmatpush1.bf16.msra.mxu0 %v4344_v52  ;;  %v4435_v52 = vld [vmem:[#allocation5 + $0x51c] ss:$24 sps:$4 sm:$0xff]  }
  0x8c   :  { %1382 = vmatpush1.bf16.msra.mxu1 %v4345_v53  ;;  %1301 = vmatprep.subr.bf16.mxu0 %v4346_v54  ;;  %v4430_v53 = vld [vmem:[#allocation5 + $0x510] ss:$24 sps:$4 sm:$0xff]  }
  0x8d   :  { %1383 = vmatprep.subr.bf16.mxu1 %v4348_v55  ;;  %v4433_v54 = vld [vmem:[#allocation5 + $0x518] ss:$24 sps:$4 sm:$0xff]   ;;  %v4438_v55 = vld [vmem:[#allocation5 + $0x544] ss:$24 sps:$4 sm:$0xff]  }
  0x8f   :  { %1302 = vmatpush1.bf16.msra.mxu0 %v4350_v56  ;;  %v4441_v56 = vld [vmem:[#allocation5 + $0x54c] ss:$24 sps:$4 sm:$0xff]  }
  0x90   :  { %1384 = vmatpush1.bf16.msra.mxu1 %v4351_v57  ;;  %1303 = vmatprep.subr.bf16.mxu0 %v4352_v58  ;;  %v4436_v57 = vld [vmem:[#allocation5 + $0x540] ss:$24 sps:$4 sm:$0xff]  }
  0x91   :  { %1385 = vmatprep.subr.bf16.mxu1 %v4354_v59  ;;  %v4439_v58 = vld [vmem:[#allocation5 + $0x548] ss:$24 sps:$4 sm:$0xff]   ;;  %v4444_v59 = vld [vmem:[#allocation5 + $0x574] ss:$24 sps:$4 sm:$0xff]  }
  0x93   :  { %1304 = vmatpush1.bf16.msra.mxu0 %v4356_v60  ;;  %v4447_v60 = vld [vmem:[#allocation5 + $0x57c] ss:$24 sps:$4 sm:$0xff]  }
  0x94   :  { %1386 = vmatpush1.bf16.msra.mxu1 %v4357_v61  ;;  %1305 = vmatprep.subr.bf16.mxu0 %v4358_v62  ;;  %v4442_v61 = vld [vmem:[#allocation5 + $0x570] ss:$24 sps:$4 sm:$0xff]  }
  0x95   :  { %1387 = vmatprep.subr.bf16.mxu1 %v4360_v63  ;;  %v4445_v62 = vld [vmem:[#allocation5 + $0x578] ss:$24 sps:$4 sm:$0xff]   ;;  %v4450_v63 = vld [vmem:[#allocation5 + $0x5a4] ss:$24 sps:$4 sm:$0xff]  }
  0x97   :  { %1306 = vmatpush1.bf16.msra.mxu0 %v4362_v0  ;;  %v4453_v0 = vld [vmem:[#allocation5 + $0x5ac] ss:$24 sps:$4 sm:$0xff]  }
  0x98   :  { %1388 = vmatpush1.bf16.msra.mxu1 %v4363_v1  ;;  %1316 = vmatprep.subr.bf16.mxu0 %v4366_v3  ;;  %v4448_v1 = vld [vmem:[#allocation5 + $0x5a0] ss:$24 sps:$4 sm:$0xff]   ;;  %v4456_v3 = vld [vmem:[#allocation5 + $0x5d4] ss:$24 sps:$4 sm:$0xff]  }
  0x99   :  { %1398 = vmatprep.subr.bf16.mxu1 %v4369_v4  ;;  %v4459_v4 = vld [vmem:[#allocation5 + $0x5dc] ss:$24 sps:$4 sm:$0xff]  }
  0x9a   :  { %1308 = vmatmul.mubr.bf16.vlgmr.msra.gmra.mrb[0].mxu0 %v5232_v5 }
  0x9b   :  { %1390 = vmatmul.mubr.bf16.vlgmr.msra.gmra.mrb[0].mxu1 %v5232_v5  ;;  %1317 = vmatpush1.bf16.msra.mxu0 %v4364_v6  ;;  %v4454_v6 = vld [vmem:[#allocation5 + $0x5d0] ss:$24 sps:$4 sm:$0xff]  }
  0x9c   :  { %1399 = vmatpush1.bf16.msra.mxu1 %v4367_v7  ;;  %1318 = vmatprep.subr.bf16.mxu0 %v4372_v8  ;;  %v4457_v7 = vld [vmem:[#allocation5 + $0x5d8] ss:$24 sps:$4 sm:$0xff]  }
  0x9d   :  { %1400 = vmatprep.subr.bf16.mxu1 %v4375_v9  ;;  %1348 = vmatprep.mubr.bf16.mxu0 %v5236_v33  ;;  %v85_v8 = vld [vmem:[#allocation2 + $0x10] sm:$0xff] }
  0x9e   :  { %1430 = vmatprep.mubr.bf16.mxu1 %v5236_v33  ;;  %v4462_v9 = vld [vmem:[#allocation5 + $0x14] ss:$24 sps:$4 sm:$0xff]  }
  0x9f   :  { %1319 = vmatpush1.bf16.msra.mxu0 %v4370_v10  ;;  %v5240_v10 = vpack.c.bf16 %v85_v8, %v85_v8  ;;  %v4510_v8 = vld [vmem:[#allocation5 + $0x314] ss:$24 sps:$4 sm:$0xff]  }
  0xa0   :  { %1401 = vmatpush1.bf16.msra.mxu1 %v4373_v11  ;;  %1320 = vmatprep.subr.bf16.mxu0 %v4378_v12  ;;  %v4460_v11 = vld [vmem:[#allocation5 + $0x10] ss:$24 sps:$4 sm:$0xff]   ;;  %v4465_v12 = vld [vmem:[#allocation5 + $0x44] ss:$24 sps:$4 sm:$0xff]  }
  0xa1   :  { %1402 = vmatprep.subr.bf16.mxu1 %v4381_v13  ;;  %v4556_v13 = vld [vmem:[#allocation8] ss:$24 sps:$4 sm:$0xff]  }
  0xa3   :  { %1321 = vmatpush1.bf16.msra.mxu0 %v4376_v14  ;;  %v4558_v14 = vld [vmem:[#allocation8 + $0x4] ss:$24 sps:$4 sm:$0xff]  }
  0xa4   :  { %1403 = vmatpush1.bf16.msra.mxu1 %v4379_v15  ;;  %1322 = vmatprep.subr.bf16.mxu0 %v4384_v16  ;;  %v4463_v15 = vld [vmem:[#allocation5 + $0x40] ss:$24 sps:$4 sm:$0xff]   ;;  %v4468_v16 = vld [vmem:[#allocation5 + $0x74] ss:$24 sps:$4 sm:$0xff]  }
  0xa5   :  { %1404 = vmatprep.subr.bf16.mxu1 %v4387_v17  ;;  %v4564_v17 = vld [vmem:[#allocation8 + $0x34] ss:$24 sps:$4 sm:$0xff]  }
  0xa7   :  { %1323 = vmatpush1.bf16.msra.mxu0 %v4382_v18  ;;  %v4562_v18 = vld [vmem:[#allocation8 + $0x30] ss:$24 sps:$4 sm:$0xff]  }
  0xa8   :  { %1405 = vmatpush1.bf16.msra.mxu1 %v4385_v19  ;;  %1324 = vmatprep.subr.bf16.mxu0 %v4390_v20  ;;  %v4466_v19 = vld [vmem:[#allocation5 + $0x70] ss:$24 sps:$4 sm:$0xff]   ;;  %v4471_v20 = vld [vmem:[#allocation5 + $0xa4] ss:$24 sps:$4 sm:$0xff]  }
  0xa9   :  { %1406 = vmatprep.subr.bf16.mxu1 %v4393_v21  ;;  %v4570_v21 = vld [vmem:[#allocation8 + $0x64] ss:$24 sps:$4 sm:$0xff]  }
  0xab   :  { %1325 = vmatpush1.bf16.msra.mxu0 %v4388_v22  ;;  %v4568_v22 = vld [vmem:[#allocation8 + $0x60] ss:$24 sps:$4 sm:$0xff]  }
  0xac   :  { %1407 = vmatpush1.bf16.msra.mxu1 %v4391_v23  ;;  %1326 = vmatprep.subr.bf16.mxu0 %v4396_v24  ;;  %v4469_v23 = vld [vmem:[#allocation5 + $0xa0] ss:$24 sps:$4 sm:$0xff]   ;;  %v4474_v24 = vld [vmem:[#allocation5 + $0xd4] ss:$24 sps:$4 sm:$0xff]  }
  0xad   :  { %1408 = vmatprep.subr.bf16.mxu1 %v4399_v25  ;;  %v4576_v25 = vld [vmem:[#allocation8 + $0x94] ss:$24 sps:$4 sm:$0xff]  }
  0xaf   :  { %1327 = vmatpush1.bf16.msra.mxu0 %v4394_v26  ;;  %v4472_v26 = vld [vmem:[#allocation5 + $0xd0] ss:$24 sps:$4 sm:$0xff]  }
  0xb0   :  { %1409 = vmatpush1.bf16.msra.mxu1 %v4397_v27  ;;  %1328 = vmatprep.subr.bf16.mxu0 %v4402_v28  ;;  %v4477_v27 = vld [vmem:[#allocation5 + $0x104] ss:$24 sps:$4 sm:$0xff]  }
  0xb1   :  { %1410 = vmatprep.subr.bf16.mxu1 %v4405_v29  ;;  %v4582_v28 = vld [vmem:[#allocation8 + $0xc4] ss:$24 sps:$4 sm:$0xff]   ;;  %v4580_v29 = vld [vmem:[#allocation8 + $0xc0] ss:$24 sps:$4 sm:$0xff]  }
  0xb3   :  { %1329 = vmatpush1.bf16.msra.mxu0 %v4400_v31  ;;  %v4480_v31 = vld [vmem:[#allocation5 + $0x134] ss:$24 sps:$4 sm:$0xff]  }
  0xb4   :  { %1411 = vmatpush1.bf16.msra.mxu1 %v4403_v32  ;;  %1330 = vmatprep.subr.bf16.mxu0 %v4408_v34  ;;  %v4588_v32 = vld [vmem:[#allocation8 + $0xf4] ss:$24 sps:$4 sm:$0xff]   ;;  %v4586_v34 = vld [vmem:[#allocation8 + $0xf0] ss:$24 sps:$4 sm:$0xff]  }
  0xb5   :  { %1412 = vmatprep.subr.bf16.mxu1 %v4411_v35  ;;  %v4478_v35 = vld [vmem:[#allocation5 + $0x130] ss:$24 sps:$4 sm:$0xff]  }
  0xb7   :  { %1331 = vmatpush1.bf16.msra.mxu0 %v4406_v36  ;;  %v4483_v36 = vld [vmem:[#allocation5 + $0x164] ss:$24 sps:$4 sm:$0xff]  }
  0xb8   :  { %1413 = vmatpush1.bf16.msra.mxu1 %v4409_v37  ;;  %1332 = vmatprep.subr.bf16.mxu0 %v4414_v38  ;;  %v4594_v37 = vld [vmem:[#allocation8 + $0x124] ss:$24 sps:$4 sm:$0xff]   ;;  %v4592_v38 = vld [vmem:[#allocation8 + $0x120] ss:$24 sps:$4 sm:$0xff]  }
  0xb9   :  { %1414 = vmatprep.subr.bf16.mxu1 %v4417_v39  ;;  %v4481_v39 = vld [vmem:[#allocation5 + $0x160] ss:$24 sps:$4 sm:$0xff]  }
  0xbb   :  { %1333 = vmatpush1.bf16.msra.mxu0 %v4412_v40  ;;  %v4486_v40 = vld [vmem:[#allocation5 + $0x194] ss:$24 sps:$4 sm:$0xff]  }
  0xbc   :  { %1415 = vmatpush1.bf16.msra.mxu1 %v4415_v41  ;;  %1334 = vmatprep.subr.bf16.mxu0 %v4420_v42  ;;  %v4600_v41 = vld [vmem:[#allocation8 + $0x154] ss:$24 sps:$4 sm:$0xff]   ;;  %v4598_v42 = vld [vmem:[#allocation8 + $0x150] ss:$24 sps:$4 sm:$0xff]  }
  0xbd   :  { %1416 = vmatprep.subr.bf16.mxu1 %v4423_v43  ;;  %v4484_v43 = vld [vmem:[#allocation5 + $0x190] ss:$24 sps:$4 sm:$0xff]  }
  0xbf   :  { %1335 = vmatpush1.bf16.msra.mxu0 %v4418_v44  ;;  %v4489_v44 = vld [vmem:[#allocation5 + $0x1c4] ss:$24 sps:$4 sm:$0xff]  }
  0xc0   :  { %1417 = vmatpush1.bf16.msra.mxu1 %v4421_v45  ;;  %1336 = vmatprep.subr.bf16.mxu0 %v4426_v46  ;;  %v4606_v45 = vld [vmem:[#allocation8 + $0x184] ss:$24 sps:$4 sm:$0xff]   ;;  %v4604_v46 = vld [vmem:[#allocation8 + $0x180] ss:$24 sps:$4 sm:$0xff]  }
  0xc1   :  { %1418 = vmatprep.subr.bf16.mxu1 %v4429_v47  ;;  %v4487_v47 = vld [vmem:[#allocation5 + $0x1c0] ss:$24 sps:$4 sm:$0xff]  }
  0xc3   :  { %1337 = vmatpush1.bf16.msra.mxu0 %v4424_v49  ;;  %v4492_v49 = vld [vmem:[#allocation5 + $0x1f4] ss:$24 sps:$4 sm:$0xff]  }
  0xc4   :  { %1419 = vmatpush1.bf16.msra.mxu1 %v4427_v50  ;;  %1338 = vmatprep.subr.bf16.mxu0 %v4432_v51  ;;  %v4612_v50 = vld [vmem:[#allocation8 + $0x1b4] ss:$24 sps:$4 sm:$0xff]   ;;  %v4610_v51 = vld [vmem:[#allocation8 + $0x1b0] ss:$24 sps:$4 sm:$0xff]  }
  0xc5   :  { %1420 = vmatprep.subr.bf16.mxu1 %v4435_v52  ;;  %v4490_v52 = vld [vmem:[#allocation5 + $0x1f0] ss:$24 sps:$4 sm:$0xff]  }
  0xc7   :  { %1339 = vmatpush1.bf16.msra.mxu0 %v4430_v53  ;;  %v4495_v53 = vld [vmem:[#allocation5 + $0x224] ss:$24 sps:$4 sm:$0xff]  }
  0xc8   :  { %1421 = vmatpush1.bf16.msra.mxu1 %v4433_v54  ;;  %1340 = vmatprep.subr.bf16.mxu0 %v4438_v55  ;;  %v4618_v54 = vld [vmem:[#allocation8 + $0x1e4] ss:$24 sps:$4 sm:$0xff]   ;;  %v4616_v55 = vld [vmem:[#allocation8 + $0x1e0] ss:$24 sps:$4 sm:$0xff]  }
  0xc9   :  { %1422 = vmatprep.subr.bf16.mxu1 %v4441_v56  ;;  %v4493_v56 = vld [vmem:[#allocation5 + $0x220] ss:$24 sps:$4 sm:$0xff]  }
  0xcb   :  { %1341 = vmatpush1.bf16.msra.mxu0 %v4436_v57  ;;  %v4498_v57 = vld [vmem:[#allocation5 + $0x254] ss:$24 sps:$4 sm:$0xff]  }
  0xcc   :  { %1423 = vmatpush1.bf16.msra.mxu1 %v4439_v58  ;;  %1342 = vmatprep.subr.bf16.mxu0 %v4444_v59  ;;  %v4624_v58 = vld [vmem:[#allocation8 + $0x214] ss:$24 sps:$4 sm:$0xff]   ;;  %v4622_v59 = vld [vmem:[#allocation8 + $0x210] ss:$24 sps:$4 sm:$0xff]  }
  0xcd   :  { %1424 = vmatprep.subr.bf16.mxu1 %v4447_v60  ;;  %v4496_v60 = vld [vmem:[#allocation5 + $0x250] ss:$24 sps:$4 sm:$0xff]  }
  0xcf   :  { %1343 = vmatpush1.bf16.msra.mxu0 %v4442_v61  ;;  %v4501_v61 = vld [vmem:[#allocation5 + $0x284] ss:$24 sps:$4 sm:$0xff]  }
  0xd0   :  { %1425 = vmatpush1.bf16.msra.mxu1 %v4445_v62  ;;  %1344 = vmatprep.subr.bf16.mxu0 %v4450_v63  ;;  %v4630_v62 = vld [vmem:[#allocation8 + $0x244] ss:$24 sps:$4 sm:$0xff]   ;;  %v4628_v63 = vld [vmem:[#allocation8 + $0x240] ss:$24 sps:$4 sm:$0xff]  }
  0xd1   :  { %1426 = vmatprep.subr.bf16.mxu1 %v4453_v0  ;;  %v4499_v0 = vld [vmem:[#allocation5 + $0x280] ss:$24 sps:$4 sm:$0xff]  }
  0xd3   :  { %1345 = vmatpush1.bf16.msra.mxu0 %v4448_v1  ;;  %v4504_v1 = vld [vmem:[#allocation5 + $0x2b4] ss:$24 sps:$4 sm:$0xff]  }
  0xd4   :  { %1427 = vmatpush1.bf16.msra.mxu1 %v4451_v2  ;;  %1346 = vmatprep.subr.bf16.mxu0 %v4456_v3  ;;  %v4636_v2 = vld [vmem:[#allocation8 + $0x274] ss:$24 sps:$4 sm:$0xff]   ;;  %v4634_v3 = vld [vmem:[#allocation8 + $0x270] ss:$24 sps:$4 sm:$0xff]  }
  0xd5   :  { %1428 = vmatprep.subr.bf16.mxu1 %v4459_v4  ;;  %v4502_v4 = vld [vmem:[#allocation5 + $0x2b0] ss:$24 sps:$4 sm:$0xff]  }
  0xd7   :  { %1347 = vmatpush1.bf16.msra.mxu0 %v4454_v6  ;;  %v4507_v6 = vld [vmem:[#allocation5 + $0x2e4] ss:$24 sps:$4 sm:$0xff]  }
  0xd8   :  { %1429 = vmatpush1.bf16.msra.mxu1 %v4457_v7  ;;  %1439 = vmatprep.subr.bf16.mxu0 %v4462_v9  ;;  %v4505_v7 = vld [vmem:[#allocation5 + $0x2e0] ss:$24 sps:$4 sm:$0xff]   ;;  %v4508_v9 = vld [vmem:[#allocation5 + $0x310] ss:$24 sps:$4 sm:$0xff]  }
  0xd9   :  { %3293 = vmatprep.subr.bf16.mxu1 %v4558_v14  ;;  %v4514_v14 = vld [vmem:[#allocation5 + $0x370] ss:$24 sps:$4 sm:$0xff]  }
  0xda   :  { %1349 = vmatmul.mubr.bf16.vlgmr.msra.gmra.mrb[0].mxu0 %v5240_v10 }
  0xdb   :  { %1431 = vmatmul.mubr.bf16.vlgmr.msra.gmra.mrb[0].mxu1 %v5240_v10  ;;  %1440 = vmatpush1.bf16.msra.mxu0 %v4460_v11  ;;  %v4513_v11 = vld [vmem:[#allocation5 + $0x344] ss:$24 sps:$4 sm:$0xff]  }
  0xdc   :  { %1471 = vmatprep.mubr.bf16.mxu0 %v5228_v48  ;;  %1441 = vmatprep.subr.bf16.mxu0 %v4465_v12  ;;  %v4574_v48 = vld [vmem:[#allocation8 + $0x90] ss:$24 sps:$4 sm:$0xff]  }
  0xdd   :  { %3294 = vmatpush1.bf16.msra.mxu1 %v4556_v13  ;;  %v4511_v12 = vld [vmem:[#allocation5 + $0x340] ss:$24 sps:$4 sm:$0xff]   ;;  %v4516_v13 = vld [vmem:[#allocation5 + $0x374] ss:$24 sps:$4 sm:$0xff]  }
  0xde   :  { %3295 = vmatprep.subr.bf16.mxu1 %v4564_v17  ;;  %v4522_v17 = vld [vmem:[#allocation5 + $0x3d4] ss:$24 sps:$4 sm:$0xff]  }
  0xdf   :  { %1442 = vmatpush1.bf16.msra.mxu0 %v4463_v15  ;;  %v4519_v15 = vld [vmem:[#allocation5 + $0x3a4] ss:$24 sps:$4 sm:$0xff]  }
  0xe0   :  { %1443 = vmatprep.subr.bf16.mxu0 %v4468_v16  ;;  %v4517_v16 = vld [vmem:[#allocation5 + $0x3a0] ss:$24 sps:$4 sm:$0xff]  }
  0xe1   :  { %3296 = vmatpush1.bf16.msra.mxu1 %v4562_v18  ;;  %v4520_v18 = vld [vmem:[#allocation5 + $0x3d0] ss:$24 sps:$4 sm:$0xff]  }
  0xe2   :  { %3297 = vmatprep.subr.bf16.mxu1 %v4570_v21  ;;  %v4528_v21 = vld [vmem:[#allocation5 + $0x434] ss:$24 sps:$4 sm:$0xff]  }
  0xe3   :  { %1444 = vmatpush1.bf16.msra.mxu0 %v4466_v19  ;;  %v4525_v19 = vld [vmem:[#allocation5 + $0x404] ss:$24 sps:$4 sm:$0xff]  }
  0xe4   :  { %1445 = vmatprep.subr.bf16.mxu0 %v4471_v20  ;;  %v4523_v20 = vld [vmem:[#allocation5 + $0x400] ss:$24 sps:$4 sm:$0xff]  }
  0xe5   :  { %3298 = vmatpush1.bf16.msra.mxu1 %v4568_v22  ;;  %v4640_v22 = vld [vmem:[#allocation8 + $0x2a0] ss:$24 sps:$4 sm:$0xff]  }
  0xe6   :  { %3299 = vmatprep.subr.bf16.mxu1 %v4576_v25  ;;  %v4646_v25 = vld [vmem:[#allocation8 + $0x2d0] ss:$24 sps:$4 sm:$0xff]  }
  0xe7   :  { %1446 = vmatpush1.bf16.msra.mxu0 %v4469_v23  ;;  %v4648_v23 = vld [vmem:[#allocation8 + $0x2d4] ss:$24 sps:$4 sm:$0xff]  }
  0xe8   :  { %1447 = vmatprep.subr.bf16.mxu0 %v4474_v24  ;;  %v4531_v24 = vld [vmem:[#allocation5 + $0x464] ss:$24 sps:$4 sm:$0xff]  }
  0xe9   :  { %3300 = vmatpush1.bf16.msra.mxu1 %v4574_v48  ;;  %v4529_v48 = vld [vmem:[#allocation5 + $0x460] ss:$24 sps:$4 sm:$0xff]  }
  0xea   :  { %3301 = vmatprep.subr.bf16.mxu1 %v4582_v28  ;;  %v4532_v28 = vld [vmem:[#allocation5 + $0x490] ss:$24 sps:$4 sm:$0xff]  }
  0xeb   :  { %1448 = vmatpush1.bf16.msra.mxu0 %v4472_v26  ;;  %v4654_v26 = vld [vmem:[#allocation8 + $0x304] ss:$24 sps:$4 sm:$0xff]  }
  0xec   :  { %1449 = vmatprep.subr.bf16.mxu0 %v4477_v27  ;;  %v4534_v27 = vld [vmem:[#allocation5 + $0x494] ss:$24 sps:$4 sm:$0xff]  }
  0xed   :  { %3302 = vmatpush1.bf16.msra.mxu1 %v4580_v29  ;;  %v4537_v29 = vld [vmem:[#allocation5 + $0x4c4] ss:$24 sps:$4 sm:$0xff]  }
  0xee   :  { %3303 = vmatprep.subr.bf16.mxu1 %v4588_v32  ;;  %v4538_v32 = vld [vmem:[#allocation5 + $0x4f0] ss:$24 sps:$4 sm:$0xff]  }
  0xef   :  { %1450 = vmatpush1.bf16.msra.mxu0 %v4475_v30  ;;  %v4535_v30 = vld [vmem:[#allocation5 + $0x4c0] ss:$24 sps:$4 sm:$0xff]  }
  0xf0   :  { %1451 = vmatprep.subr.bf16.mxu0 %v4480_v31  ;;  %v4540_v31 = vld [vmem:[#allocation5 + $0x4f4] ss:$24 sps:$4 sm:$0xff]  }
  0xf1   :  { %3304 = vmatpush1.bf16.msra.mxu1 %v4586_v34  ;;  %v4543_v34 = vld [vmem:[#allocation5 + $0x524] ss:$24 sps:$4 sm:$0xff]  }
  0xf2   :  { %3305 = vmatprep.subr.bf16.mxu1 %v4594_v37  ;;  %v4544_v37 = vld [vmem:[#allocation5 + $0x550] ss:$24 sps:$4 sm:$0xff]  }
  0xf3   :  { %1452 = vmatpush1.bf16.msra.mxu0 %v4478_v35  ;;  %v4541_v35 = vld [vmem:[#allocation5 + $0x520] ss:$24 sps:$4 sm:$0xff]  }
  0xf4   :  { %1453 = vmatprep.subr.bf16.mxu0 %v4483_v36  ;;  %v4546_v36 = vld [vmem:[#allocation5 + $0x554] ss:$24 sps:$4 sm:$0xff]  }
  0xf5   :  { %3306 = vmatpush1.bf16.msra.mxu1 %v4592_v38  ;;  %v4549_v38 = vld [vmem:[#allocation5 + $0x584] ss:$24 sps:$4 sm:$0xff]  }
  0xf6   :  { %3307 = vmatprep.subr.bf16.mxu1 %v4600_v41  ;;  %v4550_v41 = vld [vmem:[#allocation5 + $0x5b0] ss:$24 sps:$4 sm:$0xff]  }
  0xf7   :  { %1454 = vmatpush1.bf16.msra.mxu0 %v4481_v39  ;;  %v4547_v39 = vld [vmem:[#allocation5 + $0x580] ss:$24 sps:$4 sm:$0xff]  }
  0xf8   :  { %1455 = vmatprep.subr.bf16.mxu0 %v4486_v40  ;;  %v4552_v40 = vld [vmem:[#allocation5 + $0x5b4] ss:$24 sps:$4 sm:$0xff]  }
  0xf9   :  { %3308 = vmatpush1.bf16.msra.mxu1 %v4598_v42  ;;  %v4555_v42 = vld [vmem:[#allocation5 + $0x5e4] ss:$24 sps:$4 sm:$0xff]  }
  0xfa   :  { %3309 = vmatprep.subr.bf16.mxu1 %v4606_v45  ;;  %v4559_v45 = vld [vmem:[#allocation8 + $0x8] ss:$24 sps:$4 sm:$0xff]  }
  0xfb   :  { %1456 = vmatpush1.bf16.msra.mxu0 %v4484_v43  ;;  %v4553_v43 = vld [vmem:[#allocation5 + $0x5e0] ss:$24 sps:$4 sm:$0xff]  }
  0xfc   :  { %1457 = vmatprep.subr.bf16.mxu0 %v4489_v44  ;;  %v4561_v44 = vld [vmem:[#allocation8 + $0xc] ss:$24 sps:$4 sm:$0xff]  }
  0xfd   :  { %3310 = vmatpush1.bf16.msra.mxu1 %v4604_v46  ;;  %v4567_v46 = vld [vmem:[#allocation8 + $0x3c] ss:$24 sps:$4 sm:$0xff]  }
  0xfe   :  { %3311 = vmatprep.subr.bf16.mxu1 %v4612_v50  ;;  %v4571_v50 = vld [vmem:[#allocation8 + $0x68] ss:$24 sps:$4 sm:$0xff]  }
  0xff   :  { %1458 = vmatpush1.bf16.msra.mxu0 %v4487_v47  ;;  %v4565_v47 = vld [vmem:[#allocation8 + $0x38] ss:$24 sps:$4 sm:$0xff]  }
 0x100   :  { %1459 = vmatprep.subr.bf16.mxu0 %v4492_v49  ;;  %v4573_v49 = vld [vmem:[#allocation8 + $0x6c] ss:$24 sps:$4 sm:$0xff]  }
 0x101   :  { %3312 = vmatpush1.bf16.msra.mxu1 %v4610_v51  ;;  %v4579_v51 = vld [vmem:[#allocation8 + $0x9c] ss:$24 sps:$4 sm:$0xff]  }
 0x102   :  { %3313 = vmatprep.subr.bf16.mxu1 %v4618_v54  ;;  %v4583_v54 = vld [vmem:[#allocation8 + $0xc8] ss:$24 sps:$4 sm:$0xff]  }
 0x103   :  { %1460 = vmatpush1.bf16.msra.mxu0 %v4490_v52  ;;  %v4577_v52 = vld [vmem:[#allocation8 + $0x98] ss:$24 sps:$4 sm:$0xff]  }
 0x104   :  { %1461 = vmatprep.subr.bf16.mxu0 %v4495_v53  ;;  %v4585_v53 = vld [vmem:[#allocation8 + $0xcc] ss:$24 sps:$4 sm:$0xff]  }
 0x105   :  { %3314 = vmatpush1.bf16.msra.mxu1 %v4616_v55  ;;  %v4591_v55 = vld [vmem:[#allocation8 + $0xfc] ss:$24 sps:$4 sm:$0xff]  }
 0x106   :  { %3315 = vmatprep.subr.bf16.mxu1 %v4624_v58  ;;  %v4603_v58 = vld [vmem:[#allocation8 + $0x15c] ss:$24 sps:$4 sm:$0xff]  }
 0x107   :  { %1462 = vmatpush1.bf16.msra.mxu0 %v4493_v56  ;;  %v4589_v56 = vld [vmem:[#allocation8 + $0xf8] ss:$24 sps:$4 sm:$0xff]  }
 0x108   :  { %1463 = vmatprep.subr.bf16.mxu0 %v4498_v57  ;;  %v4595_v57 = vld [vmem:[#allocation8 + $0x128] ss:$24 sps:$4 sm:$0xff]  }
 0x109   :  { %3316 = vmatpush1.bf16.msra.mxu1 %v4622_v59  ;;  %v4601_v59 = vld [vmem:[#allocation8 + $0x158] ss:$24 sps:$4 sm:$0xff]  }
 0x10a   :  { %3317 = vmatprep.subr.bf16.mxu1 %v4630_v62  ;;  %v4615_v62 = vld [vmem:[#allocation8 + $0x1bc] ss:$24 sps:$4 sm:$0xff]  }
 0x10b   :  { %1464 = vmatpush1.bf16.msra.mxu0 %v4496_v60  ;;  %v4609_v60 = vld [vmem:[#allocation8 + $0x18c] ss:$24 sps:$4 sm:$0xff]  }
 0x10c   :  { %1465 = vmatprep.subr.bf16.mxu0 %v4501_v61  ;;  %v4607_v61 = vld [vmem:[#allocation8 + $0x188] ss:$24 sps:$4 sm:$0xff]  }
 0x10d   :  { %3318 = vmatpush1.bf16.msra.mxu1 %v4628_v63  ;;  %v4613_v63 = vld [vmem:[#allocation8 + $0x1b8] ss:$24 sps:$4 sm:$0xff]  }
 0x10e   :  { %3319 = vmatprep.subr.bf16.mxu1 %v4636_v2  ;;  %v4627_v2 = vld [vmem:[#allocation8 + $0x21c] ss:$24 sps:$4 sm:$0xff]  }
 0x10f   :  { %1466 = vmatpush1.bf16.msra.mxu0 %v4499_v0  ;;  %v4621_v0 = vld [vmem:[#allocation8 + $0x1ec] ss:$24 sps:$4 sm:$0xff]  }
 0x110   :  { %1467 = vmatprep.subr.bf16.mxu0 %v4504_v1  ;;  %v4619_v1 = vld [vmem:[#allocation8 + $0x1e8] ss:$24 sps:$4 sm:$0xff]  }
 0x111   :  { %3320 = vmatpush1.bf16.msra.mxu1 %v4634_v3  ;;  %v4625_v3 = vld [vmem:[#allocation8 + $0x218] ss:$24 sps:$4 sm:$0xff]  }
 0x113   :  { %1468 = vmatpush1.bf16.msra.mxu0 %v4502_v4  ;;  %v4633_v4 = vld [vmem:[#allocation8 + $0x24c] ss:$24 sps:$4 sm:$0xff]  }
 0x114   :  { %1469 = vmatprep.subr.bf16.mxu0 %v4507_v6  ;;  %v4631_v6 = vld [vmem:[#allocation8 + $0x248] ss:$24 sps:$4 sm:$0xff]  }
 0x117   :  { %1470 = vmatpush1.bf16.msra.mxu0 %v4505_v7  ;;  %v4639_v7 = vld [vmem:[#allocation8 + $0x27c] ss:$24 sps:$4 sm:$0xff]  }
 0x118   :  { %1480 = vmatprep.subr.bf16.mxu0 %v4510_v8  ;;  %v4637_v8 = vld [vmem:[#allocation8 + $0x278] ss:$24 sps:$4 sm:$0xff]  }
 0x11a   :  { %1472 = vmatmul.mubr.bf16.vlgmr.msra.gmra.mrb[4].mxu0 %v5232_v5  ;;  %v4642_v5 = vld [vmem:[#allocation8 + $0x2a4] ss:$24 sps:$4 sm:$0xff]  }
 0x11b   :  { %1481 = vmatpush1.bf16.msra.mxu0 %v4508_v9  ;;  %1512 = vmatprep.mubr.bf16.mxu0 %v5236_v33  ;;  %v4526_v33 = vld [vmem:[#allocation5 + $0x430] ss:$24 sps:$4 sm:$0xff]  }
 0x11c   :  { %1482 = vmatprep.subr.bf16.mxu0 %v4513_v11  ;;  %3321 = vmatprep.subr.bf16.mxu1 %v4642_v5  ;;  %v4645_v9 = vld [vmem:[#allocation8 + $0x2ac] ss:$24 sps:$4 sm:$0xff]   ;;  %v4643_v11 = vld [vmem:[#allocation8 + $0x2a8] ss:$24 sps:$4 sm:$0xff]  }
 0x11d   :  { %3322 = vmatpush1.bf16.msra.mxu1 %v4640_v22 }
 0x11e   :  { %3323 = vmatprep.subr.bf16.mxu1 %v4648_v23 }
 0x11f   :  { %1483 = vmatpush1.bf16.msra.mxu0 %v4511_v12  ;;  %v4651_v12 = vld [vmem:[#allocation8 + $0x2dc] ss:$24 sps:$4 sm:$0xff]  }
 0x120   :  { %1484 = vmatprep.subr.bf16.mxu0 %v4516_v13  ;;  %v4649_v13 = vld [vmem:[#allocation8 + $0x2d8] ss:$24 sps:$4 sm:$0xff]  }
 0x121   :  { %3324 = vmatpush1.bf16.msra.mxu1 %v4646_v25 }
 0x122   :  { %3334 = vmatprep.subr.bf16.mxu1 %v4654_v26 }
 0x123   :  { %1485 = vmatpush1.bf16.msra.mxu0 %v4514_v14  ;;  %v4657_v14 = vld [vmem:[#allocation8 + $0x30c] ss:$24 sps:$4 sm:$0xff]  }
 0x124   :  { %1486 = vmatprep.subr.bf16.mxu0 %v4519_v15  ;;  %v285_v15 = vlaneseq }
 0x127   :  { %1487 = vmatpush1.bf16.msra.mxu0 %v4517_v16  ;;  %v5248_v16 = vshrl.u32 %v285_v15, 7  ;;  %v4714_v15 = vld [vmem:[#allocation8 + $0x4e4] ss:$24 sps:$4 sm:$0xff]  }
 0x128   :  { %1488 = vmatprep.subr.bf16.mxu0 %v4522_v17 }
 0x129   :  { %v287_v17 = vsub.s32 0, %v5248_v16 }
 0x12b   :  { %1489 = vmatpush1.bf16.msra.mxu0 %v4520_v18  ;;  %v5251_v18 = vld [vmem:[#allocation7] sm:$0x3f] }
 0x12c   :  { %1490 = vmatprep.subr.bf16.mxu0 %v4525_v19  ;;  %v291_v19 = vsub.s32 1, %v5248_v16  ;;  %v288_v5 = vrot.slane %v5251_v18, %v287_v17 }
 0x12f   :  { %1491 = vmatpush1.bf16.msra.mxu0 %v4523_v20  ;;  %v299_v20 = vsub.s32 3, %v5248_v16 }
 0x130   :  { %1492 = vmatprep.subr.bf16.mxu0 %v4528_v21  ;;  %v292_v21 = vrot.slane %v5251_v18, %v291_v19 }
 0x131   :  { %v300_v22 = vrot.slane %v5251_v18, %v299_v20 }
 0x133   :  { %1493 = vmatpush1.bf16.msra.mxu0 %v4526_v33 }
 0x134   :  { %1494 = vmatprep.subr.bf16.mxu0 %v4531_v24 }
 0x137   :  { %1495 = vmatpush1.bf16.msra.mxu0 %v4529_v48 }
 0x138   :  { %1496 = vmatprep.subr.bf16.mxu0 %v4534_v27 }
 0x13b   :  { %1497 = vmatpush1.bf16.msra.mxu0 %v4532_v28 }
 0x13c   :  { %1498 = vmatprep.subr.bf16.mxu0 %v4537_v29 }
 0x13f   :  { %1499 = vmatpush1.bf16.msra.mxu0 %v4535_v30 }
 0x140   :  { %1500 = vmatprep.subr.bf16.mxu0 %v4540_v31 }
 0x143   :  { %1501 = vmatpush1.bf16.msra.mxu0 %v4538_v32 }
 0x144   :  { %1502 = vmatprep.subr.bf16.mxu0 %v4543_v34 }
 0x147   :  { %1503 = vmatpush1.bf16.msra.mxu0 %v4541_v35 }
 0x148   :  { %1504 = vmatprep.subr.bf16.mxu0 %v4546_v36 }
 0x14b   :  { %1505 = vmatpush1.bf16.msra.mxu0 %v4544_v37  ;;  %v4652_v37 = vld [vmem:[#allocation8 + $0x300] ss:$24 sps:$4 sm:$0xff]  }
 0x14c   :  { %1506 = vmatprep.subr.bf16.mxu0 %v4549_v38  ;;  %v4655_v38 = vld [vmem:[#allocation8 + $0x308] ss:$24 sps:$4 sm:$0xff]  }
 0x14f   :  { %1507 = vmatpush1.bf16.msra.mxu0 %v4547_v39 }
 0x150   :  { %1508 = vmatprep.subr.bf16.mxu0 %v4552_v40  ;;  %v4660_v40 = vld [vmem:[#allocation8 + $0x334] ss:$24 sps:$4 sm:$0xff]  }
 0x153   :  { %1509 = vmatpush1.bf16.msra.mxu0 %v4550_v41  ;;  %v4663_v41 = vld [vmem:[#allocation8 + $0x33c] ss:$24 sps:$4 sm:$0xff]  }
 0x154   :  { %1510 = vmatprep.subr.bf16.mxu0 %v4555_v42 }
 0x157   :  { %1511 = vmatpush1.bf16.msra.mxu0 %v4553_v43  ;;  %v4658_v43 = vld [vmem:[#allocation8 + $0x330] ss:$24 sps:$4 sm:$0xff]  }
 0x158   :  { %3416 = vmatprep.subr.bf16.mxu0 %v4561_v44  ;;  %v4661_v44 = vld [vmem:[#allocation8 + $0x338] ss:$24 sps:$4 sm:$0xff]  }
 0x15a   :  { %1513 = vmatmul.mubr.bf16.vlgmr.msra.gmra.mrb[4].mxu0 %v5240_v10  ;;  %v4597_v10 = vld [vmem:[#allocation8 + $0x12c] ss:$24 sps:$4 sm:$0xff]  }
 0x15b   :  { %3417 = vmatpush1.bf16.msra.mxu0 %v4559_v45  ;;  %v4666_v45 = vld [vmem:[#allocation8 + $0x364] ss:$24 sps:$4 sm:$0xff]  }
 0x15c   :  { %3418 = vmatprep.subr.bf16.mxu0 %v4567_v46  ;;  %v4669_v46 = vld [vmem:[#allocation8 + $0x36c] ss:$24 sps:$4 sm:$0xff]  }
 0x15f   :  { %3419 = vmatpush1.bf16.msra.mxu0 %v4565_v47  ;;  %v4664_v47 = vld [vmem:[#allocation8 + $0x360] ss:$24 sps:$4 sm:$0xff]  }
 0x160   :  { %3420 = vmatprep.subr.bf16.mxu0 %v4573_v49  ;;  %v4667_v49 = vld [vmem:[#allocation8 + $0x368] ss:$24 sps:$4 sm:$0xff]  }
 0x163   :  { %3421 = vmatpush1.bf16.msra.mxu0 %v4571_v50  ;;  %v4672_v50 = vld [vmem:[#allocation8 + $0x394] ss:$24 sps:$4 sm:$0xff]  }
 0x164   :  { %3422 = vmatprep.subr.bf16.mxu0 %v4579_v51  ;;  %v4675_v51 = vld [vmem:[#allocation8 + $0x39c] ss:$24 sps:$4 sm:$0xff]  }
 0x167   :  { %3423 = vmatpush1.bf16.msra.mxu0 %v4577_v52  ;;  %v4670_v52 = vld [vmem:[#allocation8 + $0x390] ss:$24 sps:$4 sm:$0xff]  }
 0x168   :  { %3424 = vmatprep.subr.bf16.mxu0 %v4585_v53  ;;  %v4673_v53 = vld [vmem:[#allocation8 + $0x398] ss:$24 sps:$4 sm:$0xff]  }
 0x16b   :  { %3425 = vmatpush1.bf16.msra.mxu0 %v4583_v54  ;;  %v4678_v54 = vld [vmem:[#allocation8 + $0x3c4] ss:$24 sps:$4 sm:$0xff]  }
 0x16c   :  { %3426 = vmatprep.subr.bf16.mxu0 %v4591_v55  ;;  %v4681_v55 = vld [vmem:[#allocation8 + $0x3cc] ss:$24 sps:$4 sm:$0xff]  }
 0x16f   :  { %3427 = vmatpush1.bf16.msra.mxu0 %v4589_v56  ;;  %v4676_v56 = vld [vmem:[#allocation8 + $0x3c0] ss:$24 sps:$4 sm:$0xff]  }
 0x170   :  { %3428 = vmatprep.subr.bf16.mxu0 %v4597_v10  ;;  %v4679_v10 = vld [vmem:[#allocation8 + $0x3c8] ss:$24 sps:$4 sm:$0xff]  }
 0x173   :  { %3429 = vmatpush1.bf16.msra.mxu0 %v4595_v57  ;;  %v4684_v57 = vld [vmem:[#allocation8 + $0x3f4] ss:$24 sps:$4 sm:$0xff]  }
 0x174   :  { %3430 = vmatprep.subr.bf16.mxu0 %v4603_v58  ;;  %v4687_v58 = vld [vmem:[#allocation8 + $0x3fc] ss:$24 sps:$4 sm:$0xff]  }
 0x177   :  { %3431 = vmatpush1.bf16.msra.mxu0 %v4601_v59  ;;  %v4682_v59 = vld [vmem:[#allocation8 + $0x3f0] ss:$24 sps:$4 sm:$0xff]  }
 0x178   :  { %3432 = vmatprep.subr.bf16.mxu0 %v4609_v60  ;;  %v4685_v60 = vld [vmem:[#allocation8 + $0x3f8] ss:$24 sps:$4 sm:$0xff]  }
 0x17b   :  { %3433 = vmatpush1.bf16.msra.mxu0 %v4607_v61  ;;  %v4690_v61 = vld [vmem:[#allocation8 + $0x424] ss:$24 sps:$4 sm:$0xff]  }
 0x17c   :  { %3434 = vmatprep.subr.bf16.mxu0 %v4615_v62  ;;  %v4693_v62 = vld [vmem:[#allocation8 + $0x42c] ss:$24 sps:$4 sm:$0xff]  }
 0x17f   :  { %3435 = vmatpush1.bf16.msra.mxu0 %v4613_v63  ;;  %v4688_v63 = vld [vmem:[#allocation8 + $0x420] ss:$24 sps:$4 sm:$0xff]  }
 0x180   :  { %3436 = vmatprep.subr.bf16.mxu0 %v4621_v0  ;;  %v4691_v0 = vld [vmem:[#allocation8 + $0x428] ss:$24 sps:$4 sm:$0xff]  }
 0x183   :  { %3437 = vmatpush1.bf16.msra.mxu0 %v4619_v1  ;;  %v4696_v1 = vld [vmem:[#allocation8 + $0x454] ss:$24 sps:$4 sm:$0xff]  }
 0x184   :  { %3438 = vmatprep.subr.bf16.mxu0 %v4627_v2  ;;  %v4699_v2 = vld [vmem:[#allocation8 + $0x45c] ss:$24 sps:$4 sm:$0xff]  }
 0x187   :  { %3439 = vmatpush1.bf16.msra.mxu0 %v4625_v3  ;;  %v4694_v3 = vld [vmem:[#allocation8 + $0x450] ss:$24 sps:$4 sm:$0xff]  }
 0x188   :  { %3440 = vmatprep.subr.bf16.mxu0 %v4633_v4  ;;  %v4697_v4 = vld [vmem:[#allocation8 + $0x458] ss:$24 sps:$4 sm:$0xff]  }
 0x18b   :  { %3441 = vmatpush1.bf16.msra.mxu0 %v4631_v6  ;;  %v4702_v6 = vld [vmem:[#allocation8 + $0x484] ss:$24 sps:$4 sm:$0xff]  }
 0x18c   :  { %3442 = vmatprep.subr.bf16.mxu0 %v4639_v7  ;;  %v4705_v7 = vld [vmem:[#allocation8 + $0x48c] ss:$24 sps:$4 sm:$0xff]  }
 0x18f   :  { %3443 = vmatpush1.bf16.msra.mxu0 %v4637_v8  ;;  %v4700_v8 = vld [vmem:[#allocation8 + $0x480] ss:$24 sps:$4 sm:$0xff]  }
 0x190   :  { %3444 = vmatprep.subr.bf16.mxu0 %v4645_v9  ;;  %v4703_v9 = vld [vmem:[#allocation8 + $0x488] ss:$24 sps:$4 sm:$0xff]  }
 0x193   :  { %3445 = vmatpush1.bf16.msra.mxu0 %v4643_v11  ;;  %v4708_v11 = vld [vmem:[#allocation8 + $0x4b4] ss:$24 sps:$4 sm:$0xff]  }
 0x194   :  { %3446 = vmatprep.subr.bf16.mxu0 %v4651_v12  ;;  %v4711_v12 = vld [vmem:[#allocation8 + $0x4bc] ss:$24 sps:$4 sm:$0xff]  }
 0x197   :  { %3447 = vmatpush1.bf16.msra.mxu0 %v4649_v13  ;;  %v4706_v13 = vld [vmem:[#allocation8 + $0x4b0] ss:$24 sps:$4 sm:$0xff]  }
 0x198   :  { %3457 = vmatprep.subr.bf16.mxu0 %v4657_v14  ;;  %v4709_v14 = vld [vmem:[#allocation8 + $0x4b8] ss:$24 sps:$4 sm:$0xff]  }
 0x1ad   :  { %v1350_v33 = vpop.f32.mrb[0].mxu0 }
 0x1ae   :  { %v5264_v23 = vpop.f32.mrb[0].mxu1  ;;  %v4212_v24 = vadd.f32 %v1350_v33, %v288_v5  ;;  %v1352_v25 = vpop.f32.mrb[1].mxu0  ;;  %v4717_v5 = vld [vmem:[#allocation8 + $0x4ec] ss:$24 sps:$4 sm:$0xff]  }
 0x1af   :  { %v1434_v48 = vpop.f32.mrb[1].mxu1  ;;  %v4213_v26 = vadd.f32 %v1352_v25, %v292_v21  ;;  %v1354_v28 = vpop.f32.mrb[2].mxu0  ;;  %v4712_v21 = vld [vmem:[#allocation8 + $0x4e0] ss:$24 sps:$4 sm:$0xff]   ;;  %v4720_v33 = vld [vmem:[#allocation8 + $0x514] ss:$24 sps:$4 sm:$0xff]  }
 0x1b0   :  { %v4215_v27 = vadd.f32 %v1434_v48, %v300_v22  ;;  %v1436_v29 = vpop.f32.mrb[2].mxu1  ;;  %v1521_v30 = vmax.f32 %v4212_v24, 0.0  ;;  %v1355_v31 = vpop.f32.mrb[3].mxu0  ;;  %v4715_v22 = vld [vmem:[#allocation8 + $0x4e8] ss:$24 sps:$4 sm:$0xff]  }
 0x1b1   :  { %v1437_v32 = vpop.f32.mrb[3].mxu1  ;;  %v1522_v34 = vmax.f32 %v4213_v26, 0.0  ;;  %v4723_v24 = vld [vmem:[#allocation8 + $0x51c] ss:$24 sps:$4 sm:$0xff]   ;;  %v4718_v25 = vld [vmem:[#allocation8 + $0x510] ss:$24 sps:$4 sm:$0xff]  }
 0x1b2   :  { %v1524_v35 = vmax.f32 %v4215_v27, 0.0  ;;  %v5268_v39 = vpack.c.bf16 %v1521_v30, %v1521_v30  ;;  %v4721_v48 = vld [vmem:[#allocation8 + $0x518] ss:$24 sps:$4 sm:$0xff]   ;;  %v4726_v26 = vld [vmem:[#allocation8 + $0x544] ss:$24 sps:$4 sm:$0xff]   ;;  %v295_v30 = vsub.s32 2, %v5248_v16 }
 0x1b3   :  { %v5266_v36 = vpack.c.bf16 %v1522_v34, %v1522_v34  ;;  %v4729_v27 = vld [vmem:[#allocation8 + $0x54c] ss:$24 sps:$4 sm:$0xff]   ;;  %v4724_v28 = vld [vmem:[#allocation8 + $0x540] ss:$24 sps:$4 sm:$0xff]   ;;  %v4735_v32 = vld [vmem:[#allocation8 + $0x57c] ss:$24 sps:$4 sm:$0xff]  }
 0x1b4   :  { %v5272_v42 = vpack.c.bf16 %v1524_v35, %v1524_v35  ;;  %v4727_v29 = vld [vmem:[#allocation8 + $0x548] ss:$24 sps:$4 sm:$0xff]   ;;  %v4732_v31 = vld [vmem:[#allocation8 + $0x574] ss:$24 sps:$4 sm:$0xff]   ;;  %v4733_v35 = vld [vmem:[#allocation8 + $0x578] ss:$24 sps:$4 sm:$0xff]  }
 0x1b5   :  { %3325 = vmatprep.mubr.bf16.mxu1 %v5266_v36  ;;  %3448 = vmatprep.mubr.bf16.mxu0 %v5266_v36  ;;  %v4730_v34 = vld [vmem:[#allocation8 + $0x570] ss:$24 sps:$4 sm:$0xff]  }
 0x1b6   :  { %3326 = vmatmul.mubr.bf16.vlgmr.msra.gmra.mrb[4].mxu1 %v5268_v39  ;;  %3449 = vmatmul.mubr.bf16.vlgmr.msra.gmra.mrb[8].mxu0 %v5268_v39 }
 0x1b7   :  { %3335 = vmatpush1.bf16.msra.mxu1 %v4652_v37  ;;  %3458 = vmatpush1.bf16.msra.mxu0 %v4655_v38  ;;  %v296_v37 = vrot.slane %v5251_v18, %v295_v30  ;;  %v4738_v38 = vld [vmem:[#allocation8 + $0x5a4] ss:$24 sps:$4 sm:$0xff]  }
 0x1b8   :  { %3366 = vmatprep.mubr.bf16.mxu1 %v5272_v42  ;;  %3489 = vmatprep.mubr.bf16.mxu0 %v5272_v42 }
 0x1b9   :  { %3336 = vmatprep.subr.bf16.mxu1 %v4660_v40  ;;  %3459 = vmatprep.subr.bf16.mxu0 %v4663_v41  ;;  %v4741_v40 = vld [vmem:[#allocation8 + $0x5ac] ss:$24 sps:$4 sm:$0xff]   ;;  %v4736_v41 = vld [vmem:[#allocation8 + $0x5a0] ss:$24 sps:$4 sm:$0xff]  }
 0x1bb   :  { %3337 = vmatpush1.bf16.msra.mxu1 %v4658_v43  ;;  %3460 = vmatpush1.bf16.msra.mxu0 %v4661_v44  ;;  %v4739_v43 = vld [vmem:[#allocation8 + $0x5a8] ss:$24 sps:$4 sm:$0xff]   ;;  %v4214_v44 = vadd.f32 %v5264_v23, %v296_v37  ;;  %v4756_v23 = vld [vmem:[#allocation8 + $0x634] ss:$24 sps:$4 sm:$0xff]  }
 0x1bc   :  { %3338 = vmatprep.subr.bf16.mxu1 %v4666_v45  ;;  %3461 = vmatprep.subr.bf16.mxu0 %v4669_v46  ;;  %v4744_v45 = vld [vmem:[#allocation8 + $0x5d4] ss:$24 sps:$4 sm:$0xff]   ;;  %v4811_v37 = vld [vmem:[#allocation8 + $0x7e8] ss:$24 sps:$4 sm:$0xff]  }
 0x1bd   :  { %v4747_v46 = vld [vmem:[#allocation8 + $0x5dc] ss:$24 sps:$4 sm:$0xff]  }
 0x1bf   :  { %3339 = vmatpush1.bf16.msra.mxu1 %v4664_v47  ;;  %3462 = vmatpush1.bf16.msra.mxu0 %v4667_v49  ;;  %v4742_v47 = vld [vmem:[#allocation8 + $0x5d0] ss:$24 sps:$4 sm:$0xff]  }
 0x1c0   :  { %3340 = vmatprep.subr.bf16.mxu1 %v4672_v50  ;;  %3463 = vmatprep.subr.bf16.mxu0 %v4675_v51  ;;  %v4745_v49 = vld [vmem:[#allocation8 + $0x5d8] ss:$24 sps:$4 sm:$0xff]   ;;  %v1523_v50 = vmax.f32 %v4214_v44, 0.0  ;;  %v4750_v51 = vld [vmem:[#allocation8 + $0x604] ss:$24 sps:$4 sm:$0xff]  }
 0x1c1   :  { %v4822_v44 = vld [vmem:[#allocation8 + $0x844] ss:$24 sps:$4 sm:$0xff]  }
 0x1c3   :  { %3341 = vmatpush1.bf16.msra.mxu1 %v4670_v52  ;;  %3464 = vmatpush1.bf16.msra.mxu0 %v4673_v53  ;;  %v4753_v52 = vld [vmem:[#allocation8 + $0x60c] ss:$24 sps:$4 sm:$0xff]   ;;  %v4748_v53 = vld [vmem:[#allocation8 + $0x600] ss:$24 sps:$4 sm:$0xff]  }
 0x1c4   :  { %3342 = vmatprep.subr.bf16.mxu1 %v4678_v54  ;;  %3465 = vmatprep.subr.bf16.mxu0 %v4681_v55  ;;  %v4751_v54 = vld [vmem:[#allocation8 + $0x608] ss:$24 sps:$4 sm:$0xff]   ;;  %v5283_v55 = vpack.c.bf16 %v1523_v50, %v1523_v50  ;;  %v4831_v50 = vld [vmem:[#allocation8 + $0x87c] ss:$24 sps:$4 sm:$0xff]  }
 0x1c7   :  { %3343 = vmatpush1.bf16.msra.mxu1 %v4676_v56  ;;  %3466 = vmatpush1.bf16.msra.mxu0 %v4679_v10  ;;  %v4759_v56 = vld [vmem:[#allocation8 + $0x63c] ss:$24 sps:$4 sm:$0xff]   ;;  %v4754_v10 = vld [vmem:[#allocation8 + $0x630] ss:$24 sps:$4 sm:$0xff]  }
 0x1c8   :  { %3344 = vmatprep.subr.bf16.mxu1 %v4684_v57  ;;  %3467 = vmatprep.subr.bf16.mxu0 %v4687_v58  ;;  %v4757_v57 = vld [vmem:[#allocation8 + $0x638] ss:$24 sps:$4 sm:$0xff]   ;;  %v4762_v58 = vld [vmem:[#allocation8 + $0x664] ss:$24 sps:$4 sm:$0xff]  }
 0x1cb   :  { %3345 = vmatpush1.bf16.msra.mxu1 %v4682_v59  ;;  %3468 = vmatpush1.bf16.msra.mxu0 %v4685_v60  ;;  %v4765_v59 = vld [vmem:[#allocation8 + $0x66c] ss:$24 sps:$4 sm:$0xff]   ;;  %v4760_v60 = vld [vmem:[#allocation8 + $0x660] ss:$24 sps:$4 sm:$0xff]  }
 0x1cc   :  { %3346 = vmatprep.subr.bf16.mxu1 %v4690_v61  ;;  %3469 = vmatprep.subr.bf16.mxu0 %v4693_v62  ;;  %v4763_v61 = vld [vmem:[#allocation8 + $0x668] ss:$24 sps:$4 sm:$0xff]   ;;  %v4768_v62 = vld [vmem:[#allocation8 + $0x694] ss:$24 sps:$4 sm:$0xff]  }
 0x1cf   :  { %3347 = vmatpush1.bf16.msra.mxu1 %v4688_v63  ;;  %3470 = vmatpush1.bf16.msra.mxu0 %v4691_v0  ;;  %v4771_v63 = vld [vmem:[#allocation8 + $0x69c] ss:$24 sps:$4 sm:$0xff]   ;;  %v4766_v0 = vld [vmem:[#allocation8 + $0x690] ss:$24 sps:$4 sm:$0xff]  }
 0x1d0   :  { %3348 = vmatprep.subr.bf16.mxu1 %v4696_v1  ;;  %3471 = vmatprep.subr.bf16.mxu0 %v4699_v2  ;;  %v4769_v1 = vld [vmem:[#allocation8 + $0x698] ss:$24 sps:$4 sm:$0xff]   ;;  %v4774_v2 = vld [vmem:[#allocation8 + $0x6c4] ss:$24 sps:$4 sm:$0xff]  }
 0x1d3   :  { %3349 = vmatpush1.bf16.msra.mxu1 %v4694_v3  ;;  %3472 = vmatpush1.bf16.msra.mxu0 %v4697_v4  ;;  %v4777_v3 = vld [vmem:[#allocation8 + $0x6cc] ss:$24 sps:$4 sm:$0xff]   ;;  %v4772_v4 = vld [vmem:[#allocation8 + $0x6c0] ss:$24 sps:$4 sm:$0xff]  }
 0x1d4   :  { %3350 = vmatprep.subr.bf16.mxu1 %v4702_v6  ;;  %3473 = vmatprep.subr.bf16.mxu0 %v4705_v7  ;;  %v4775_v6 = vld [vmem:[#allocation8 + $0x6c8] ss:$24 sps:$4 sm:$0xff]   ;;  %v4780_v7 = vld [vmem:[#allocation8 + $0x6f4] ss:$24 sps:$4 sm:$0xff]  }
 0x1d7   :  { %3351 = vmatpush1.bf16.msra.mxu1 %v4700_v8  ;;  %3474 = vmatpush1.bf16.msra.mxu0 %v4703_v9  ;;  %v4783_v8 = vld [vmem:[#allocation8 + $0x6fc] ss:$24 sps:$4 sm:$0xff]   ;;  %v4778_v9 = vld [vmem:[#allocation8 + $0x6f0] ss:$24 sps:$4 sm:$0xff]  }
 0x1d8   :  { %3352 = vmatprep.subr.bf16.mxu1 %v4708_v11  ;;  %3475 = vmatprep.subr.bf16.mxu0 %v4711_v12  ;;  %v4781_v11 = vld [vmem:[#allocation8 + $0x6f8] ss:$24 sps:$4 sm:$0xff]   ;;  %v4786_v12 = vld [vmem:[#allocation8 + $0x724] ss:$24 sps:$4 sm:$0xff]  }
 0x1db   :  { %3353 = vmatpush1.bf16.msra.mxu1 %v4706_v13  ;;  %3476 = vmatpush1.bf16.msra.mxu0 %v4709_v14  ;;  %v4789_v13 = vld [vmem:[#allocation8 + $0x72c] ss:$24 sps:$4 sm:$0xff]   ;;  %v4784_v14 = vld [vmem:[#allocation8 + $0x720] ss:$24 sps:$4 sm:$0xff]  }
 0x1dc   :  { %3354 = vmatprep.subr.bf16.mxu1 %v4714_v15  ;;  %3477 = vmatprep.subr.bf16.mxu0 %v4717_v5  ;;  %v4787_v15 = vld [vmem:[#allocation8 + $0x728] ss:$24 sps:$4 sm:$0xff]   ;;  %v4792_v5 = vld [vmem:[#allocation8 + $0x754] ss:$24 sps:$4 sm:$0xff]  }
 0x1df   :  { %3355 = vmatpush1.bf16.msra.mxu1 %v4712_v21  ;;  %3478 = vmatpush1.bf16.msra.mxu0 %v4715_v22  ;;  %v4795_v21 = vld [vmem:[#allocation8 + $0x75c] ss:$24 sps:$4 sm:$0xff]   ;;  %v4790_v22 = vld [vmem:[#allocation8 + $0x750] ss:$24 sps:$4 sm:$0xff]  }
 0x1e0   :  { %3356 = vmatprep.subr.bf16.mxu1 %v4720_v33  ;;  %3479 = vmatprep.subr.bf16.mxu0 %v4723_v24  ;;  %v4793_v33 = vld [vmem:[#allocation8 + $0x758] ss:$24 sps:$4 sm:$0xff]   ;;  %v4798_v24 = vld [vmem:[#allocation8 + $0x784] ss:$24 sps:$4 sm:$0xff]  }
 0x1e3   :  { %3357 = vmatpush1.bf16.msra.mxu1 %v4718_v25  ;;  %3480 = vmatpush1.bf16.msra.mxu0 %v4721_v48  ;;  %v4801_v25 = vld [vmem:[#allocation8 + $0x78c] ss:$24 sps:$4 sm:$0xff]   ;;  %v4796_v48 = vld [vmem:[#allocation8 + $0x780] ss:$24 sps:$4 sm:$0xff]  }
 0x1e4   :  { %3358 = vmatprep.subr.bf16.mxu1 %v4726_v26  ;;  %3481 = vmatprep.subr.bf16.mxu0 %v4729_v27  ;;  %v4799_v26 = vld [vmem:[#allocation8 + $0x788] ss:$24 sps:$4 sm:$0xff]   ;;  %v4804_v27 = vld [vmem:[#allocation8 + $0x7b4] ss:$24 sps:$4 sm:$0xff]  }
 0x1e7   :  { %3359 = vmatpush1.bf16.msra.mxu1 %v4724_v28  ;;  %3482 = vmatpush1.bf16.msra.mxu0 %v4727_v29  ;;  %v4807_v28 = vld [vmem:[#allocation8 + $0x7bc] ss:$24 sps:$4 sm:$0xff]   ;;  %v4802_v29 = vld [vmem:[#allocation8 + $0x7b0] ss:$24 sps:$4 sm:$0xff]  }
 0x1e8   :  { %3360 = vmatprep.subr.bf16.mxu1 %v4732_v31  ;;  %3483 = vmatprep.subr.bf16.mxu0 %v4735_v32  ;;  %v4805_v31 = vld [vmem:[#allocation8 + $0x7b8] ss:$24 sps:$4 sm:$0xff]   ;;  %v4810_v32 = vld [vmem:[#allocation8 + $0x7e4] ss:$24 sps:$4 sm:$0xff]  }
 0x1eb   :  { %3361 = vmatpush1.bf16.msra.mxu1 %v4730_v34  ;;  %3484 = vmatpush1.bf16.msra.mxu0 %v4733_v35  ;;  %v4813_v34 = vld [vmem:[#allocation8 + $0x7ec] ss:$24 sps:$4 sm:$0xff]   ;;  %v4808_v35 = vld [vmem:[#allocation8 + $0x7e0] ss:$24 sps:$4 sm:$0xff]  }
 0x1ec   :  { %3362 = vmatprep.subr.bf16.mxu1 %v4738_v38  ;;  %3485 = vmatprep.subr.bf16.mxu0 %v4741_v40  ;;  %v4816_v38 = vld [vmem:[#allocation8 + $0x814] ss:$24 sps:$4 sm:$0xff]  }
 0x1ed   :  { %v4819_v40 = vld [vmem:[#allocation8 + $0x81c] ss:$24 sps:$4 sm:$0xff]  }
 0x1ef   :  { %3363 = vmatpush1.bf16.msra.mxu1 %v4736_v41  ;;  %3486 = vmatpush1.bf16.msra.mxu0 %v4739_v43  ;;  %v4814_v41 = vld [vmem:[#allocation8 + $0x810] ss:$24 sps:$4 sm:$0xff]  }
 0x1f0   :  { %3364 = vmatprep.subr.bf16.mxu1 %v4744_v45  ;;  %3487 = vmatprep.subr.bf16.mxu0 %v4747_v46  ;;  %v4817_v43 = vld [vmem:[#allocation8 + $0x818] ss:$24 sps:$4 sm:$0xff]   ;;  %v4825_v45 = vld [vmem:[#allocation8 + $0x84c] ss:$24 sps:$4 sm:$0xff]  }
 0x1f1   :  { %v4820_v46 = vld [vmem:[#allocation8 + $0x840] ss:$24 sps:$4 sm:$0xff]  }
 0x1f3   :  { %3365 = vmatpush1.bf16.msra.mxu1 %v4742_v47  ;;  %3488 = vmatpush1.bf16.msra.mxu0 %v4745_v49  ;;  %v4823_v47 = vld [vmem:[#allocation8 + $0x848] ss:$24 sps:$4 sm:$0xff]   ;;  %v4828_v49 = vld [vmem:[#allocation8 + $0x874] ss:$24 sps:$4 sm:$0xff]  }
 0x1f4   :  { %3375 = vmatprep.subr.bf16.mxu1 %v4750_v51  ;;  %3498 = vmatprep.subr.bf16.mxu0 %v4753_v52  ;;  %v303_v51 = vsub.s32 4, %v5248_v16  ;;  %v4826_v52 = vld [vmem:[#allocation8 + $0x870] ss:$24 sps:$4 sm:$0xff]  }
 0x1f6   :  { %3367 = vmatmul.mubr.bf16.vlgmr.msra.gmra.mrb[4].mxu1 %v5283_v55  ;;  %3490 = vmatmul.mubr.bf16.vlgmr.msra.gmra.mrb[8].mxu0 %v5283_v55 }
 0x1f7   :  { %3376 = vmatpush1.bf16.msra.mxu1 %v4748_v53  ;;  %3499 = vmatpush1.bf16.msra.mxu0 %v4751_v54  ;;  %v4829_v53 = vld [vmem:[#allocation8 + $0x878] ss:$24 sps:$4 sm:$0xff]   ;;  %v307_v54 = vsub.s32 5, %v5248_v16 }
 0x1f8   :  { %3377 = vmatprep.subr.bf16.mxu1 %v4756_v23  ;;  %3500 = vmatprep.subr.bf16.mxu0 %v4759_v56  ;;  %v4834_v23 = vld [vmem:[#allocation8 + $0x8a4] ss:$24 sps:$4 sm:$0xff]  }
 0x1f9   :  { %v4837_v56 = vld [vmem:[#allocation8 + $0x8ac] ss:$24 sps:$4 sm:$0xff]  }
 0x1fb   :  { %3378 = vmatpush1.bf16.msra.mxu1 %v4754_v10  ;;  %3501 = vmatpush1.bf16.msra.mxu0 %v4757_v57  ;;  %v304_v10 = vrot.slane %v5251_v18, %v303_v51  ;;  %v4832_v57 = vld [vmem:[#allocation8 + $0x8a0] ss:$24 sps:$4 sm:$0xff]  }
 0x1fc   :  { %3379 = vmatprep.subr.bf16.mxu1 %v4762_v58  ;;  %3502 = vmatprep.subr.bf16.mxu0 %v4765_v59  ;;  %v308_v58 = vrot.slane %v5251_v18, %v307_v54  ;;  %v4835_v59 = vld [vmem:[#allocation8 + $0x8a8] ss:$24 sps:$4 sm:$0xff]  }
 0x1ff   :  { %3380 = vmatpush1.bf16.msra.mxu1 %v4760_v60  ;;  %3503 = vmatpush1.bf16.msra.mxu0 %v4763_v61  ;;  %v4840_v60 = vld [vmem:[#allocation8 + $0x8d4] ss:$24 sps:$4 sm:$0xff]  }
 0x200   :  { %3381 = vmatprep.subr.bf16.mxu1 %v4768_v62  ;;  %3504 = vmatprep.subr.bf16.mxu0 %v4771_v63  ;;  %v4843_v61 = vld [vmem:[#allocation8 + $0x8dc] ss:$24 sps:$4 sm:$0xff]  }
 0x203   :  { %3382 = vmatpush1.bf16.msra.mxu1 %v4766_v0  ;;  %3505 = vmatpush1.bf16.msra.mxu0 %v4769_v1 }
 0x204   :  { %3383 = vmatprep.subr.bf16.mxu1 %v4774_v2  ;;  %3506 = vmatprep.subr.bf16.mxu0 %v4777_v3  ;;  %v4838_v3 = vld [vmem:[#allocation8 + $0x8d0] ss:$24 sps:$4 sm:$0xff]  }
 0x207   :  { %3384 = vmatpush1.bf16.msra.mxu1 %v4772_v4  ;;  %3507 = vmatpush1.bf16.msra.mxu0 %v4775_v6  ;;  %v4841_v4 = vld [vmem:[#allocation8 + $0x8d8] ss:$24 sps:$4 sm:$0xff]  }
 0x208   :  { %3385 = vmatprep.subr.bf16.mxu1 %v4780_v7  ;;  %3508 = vmatprep.subr.bf16.mxu0 %v4783_v8  ;;  %v4846_v8 = vld [vmem:[#allocation8 + $0x14] ss:$24 sps:$4 sm:$0xff]  }
 0x20b   :  { %3386 = vmatpush1.bf16.msra.mxu1 %v4778_v9  ;;  %3509 = vmatpush1.bf16.msra.mxu0 %v4781_v11  ;;  %v4844_v11 = vld [vmem:[#allocation8 + $0x10] ss:$24 sps:$4 sm:$0xff]  }
 0x20c   :  { %3387 = vmatprep.subr.bf16.mxu1 %v4786_v12  ;;  %3510 = vmatprep.subr.bf16.mxu0 %v4789_v13  ;;  %v4849_v13 = vld [vmem:[#allocation8 + $0x44] ss:$24 sps:$4 sm:$0xff]  }
 0x20f   :  { %3388 = vmatpush1.bf16.msra.mxu1 %v4784_v14  ;;  %3511 = vmatpush1.bf16.msra.mxu0 %v4787_v15  ;;  %v4847_v14 = vld [vmem:[#allocation8 + $0x40] ss:$24 sps:$4 sm:$0xff]   ;;  %v4852_v15 = vld [vmem:[#allocation8 + $0x74] ss:$24 sps:$4 sm:$0xff]  }
 0x210   :  { %3389 = vmatprep.subr.bf16.mxu1 %v4792_v5  ;;  %3512 = vmatprep.subr.bf16.mxu0 %v4795_v21  ;;  %v4850_v5 = vld [vmem:[#allocation8 + $0x70] ss:$24 sps:$4 sm:$0xff]   ;;  %v4855_v21 = vld [vmem:[#allocation8 + $0xa4] ss:$24 sps:$4 sm:$0xff]  }
 0x213   :  { %3390 = vmatpush1.bf16.msra.mxu1 %v4790_v22  ;;  %3513 = vmatpush1.bf16.msra.mxu0 %v4793_v33  ;;  %v4853_v22 = vld [vmem:[#allocation8 + $0xa0] ss:$24 sps:$4 sm:$0xff]   ;;  %v4858_v33 = vld [vmem:[#allocation8 + $0xd4] ss:$24 sps:$4 sm:$0xff]  }
 0x214   :  { %3391 = vmatprep.subr.bf16.mxu1 %v4798_v24  ;;  %3514 = vmatprep.subr.bf16.mxu0 %v4801_v25  ;;  %v4856_v24 = vld [vmem:[#allocation8 + $0xd0] ss:$24 sps:$4 sm:$0xff]   ;;  %v4861_v25 = vld [vmem:[#allocation8 + $0x104] ss:$24 sps:$4 sm:$0xff]  }
 0x217   :  { %3392 = vmatpush1.bf16.msra.mxu1 %v4796_v48  ;;  %3515 = vmatpush1.bf16.msra.mxu0 %v4799_v26  ;;  %v4859_v48 = vld [vmem:[#allocation8 + $0x100] ss:$24 sps:$4 sm:$0xff]   ;;  %v4864_v26 = vld [vmem:[#allocation8 + $0x134] ss:$24 sps:$4 sm:$0xff]  }
 0x218   :  { %3393 = vmatprep.subr.bf16.mxu1 %v4804_v27  ;;  %3516 = vmatprep.subr.bf16.mxu0 %v4807_v28  ;;  %v4867_v27 = vld [vmem:[#allocation8 + $0x164] ss:$24 sps:$4 sm:$0xff]   ;;  %v4865_v28 = vld [vmem:[#allocation8 + $0x160] ss:$24 sps:$4 sm:$0xff]  }
 0x21b   :  { %3394 = vmatpush1.bf16.msra.mxu1 %v4802_v29  ;;  %3517 = vmatpush1.bf16.msra.mxu0 %v4805_v31  ;;  %v4870_v29 = vld [vmem:[#allocation8 + $0x194] ss:$24 sps:$4 sm:$0xff]   ;;  %v4868_v31 = vld [vmem:[#allocation8 + $0x190] ss:$24 sps:$4 sm:$0xff]  }
 0x21c   :  { %3395 = vmatprep.subr.bf16.mxu1 %v4810_v32  ;;  %3518 = vmatprep.subr.bf16.mxu0 %v4813_v34  ;;  %v4873_v32 = vld [vmem:[#allocation8 + $0x1c4] ss:$24 sps:$4 sm:$0xff]   ;;  %v4871_v34 = vld [vmem:[#allocation8 + $0x1c0] ss:$24 sps:$4 sm:$0xff]  }
 0x21f   :  { %3396 = vmatpush1.bf16.msra.mxu1 %v4808_v35  ;;  %3519 = vmatpush1.bf16.msra.mxu0 %v4811_v37  ;;  %v4876_v35 = vld [vmem:[#allocation8 + $0x1f4] ss:$24 sps:$4 sm:$0xff]   ;;  %v4874_v37 = vld [vmem:[#allocation8 + $0x1f0] ss:$24 sps:$4 sm:$0xff]  }
 0x220   :  { %3397 = vmatprep.subr.bf16.mxu1 %v4816_v38  ;;  %3520 = vmatprep.subr.bf16.mxu0 %v4819_v40  ;;  %v4879_v38 = vld [vmem:[#allocation8 + $0x224] ss:$24 sps:$4 sm:$0xff]   ;;  %v4877_v40 = vld [vmem:[#allocation8 + $0x220] ss:$24 sps:$4 sm:$0xff]  }
 0x223   :  { %3398 = vmatpush1.bf16.msra.mxu1 %v4814_v41  ;;  %3521 = vmatpush1.bf16.msra.mxu0 %v4817_v43  ;;  %v4882_v41 = vld [vmem:[#allocation8 + $0x254] ss:$24 sps:$4 sm:$0xff]   ;;  %v4880_v43 = vld [vmem:[#allocation8 + $0x250] ss:$24 sps:$4 sm:$0xff]  }
 0x224   :  { %3399 = vmatprep.subr.bf16.mxu1 %v4822_v44  ;;  %3522 = vmatprep.subr.bf16.mxu0 %v4825_v45  ;;  %v4885_v44 = vld [vmem:[#allocation8 + $0x284] ss:$24 sps:$4 sm:$0xff]   ;;  %v4883_v45 = vld [vmem:[#allocation8 + $0x280] ss:$24 sps:$4 sm:$0xff]  }
 0x227   :  { %3400 = vmatpush1.bf16.msra.mxu1 %v4820_v46  ;;  %3523 = vmatpush1.bf16.msra.mxu0 %v4823_v47  ;;  %v4888_v46 = vld [vmem:[#allocation8 + $0x2b4] ss:$24 sps:$4 sm:$0xff]   ;;  %v4886_v47 = vld [vmem:[#allocation8 + $0x2b0] ss:$24 sps:$4 sm:$0xff]  }
 0x228   :  { %3401 = vmatprep.subr.bf16.mxu1 %v4828_v49  ;;  %3524 = vmatprep.subr.bf16.mxu0 %v4831_v50  ;;  %v4891_v49 = vld [vmem:[#allocation8 + $0x2e4] ss:$24 sps:$4 sm:$0xff]   ;;  %v4889_v50 = vld [vmem:[#allocation8 + $0x2e0] ss:$24 sps:$4 sm:$0xff]  }
 0x22b   :  { %3402 = vmatpush1.bf16.msra.mxu1 %v4826_v52  ;;  %3525 = vmatpush1.bf16.msra.mxu0 %v4829_v53  ;;  %v4894_v52 = vld [vmem:[#allocation8 + $0x314] ss:$24 sps:$4 sm:$0xff]   ;;  %v4892_v53 = vld [vmem:[#allocation8 + $0x310] ss:$24 sps:$4 sm:$0xff]  }
 0x22c   :  { %3403 = vmatprep.subr.bf16.mxu1 %v4834_v23  ;;  %3526 = vmatprep.subr.bf16.mxu0 %v4837_v56  ;;  %v4897_v23 = vld [vmem:[#allocation8 + $0x344] ss:$24 sps:$4 sm:$0xff]   ;;  %v4895_v56 = vld [vmem:[#allocation8 + $0x340] ss:$24 sps:$4 sm:$0xff]  }
 0x22d   :  { %v1514_v62 = vpop.f32.mrb[4].mxu0 }
 0x22e   :  { %v4216_v63 = vadd.f32 %v1514_v62, %v304_v10  ;;  %v1516_v0 = vpop.f32.mrb[5].mxu0  ;;  %v4900_v10 = vld [vmem:[#allocation8 + $0x374] ss:$24 sps:$4 sm:$0xff]   ;;  %v4909_v62 = vld [vmem:[#allocation8 + $0x404] ss:$24 sps:$4 sm:$0xff]  }
 0x22f   :  { %v4217_v1 = vadd.f32 %v1516_v0, %v308_v58  ;;  %3404 = vmatpush1.bf16.msra.mxu1 %v4832_v57  ;;  %v1518_v2 = vpop.f32.mrb[6].mxu0  ;;  %3527 = vmatpush1.bf16.msra.mxu0 %v4835_v59  ;;  %v4898_v57 = vld [vmem:[#allocation8 + $0x370] ss:$24 sps:$4 sm:$0xff]   ;;  %v4903_v58 = vld [vmem:[#allocation8 + $0x3a4] ss:$24 sps:$4 sm:$0xff]  }
 0x230   :  { %v1525_v6 = vmax.f32 %v4216_v63, 0.0  ;;  %v1519_v7 = vpop.f32.mrb[7].mxu0  ;;  %3405 = vmatprep.subr.bf16.mxu1 %v4840_v60  ;;  %3528 = vmatprep.subr.bf16.mxu0 %v4843_v61  ;;  %v4901_v59 = vld [vmem:[#allocation8 + $0x3a0] ss:$24 sps:$4 sm:$0xff]   ;;  %v4906_v60 = vld [vmem:[#allocation8 + $0x3d4] ss:$24 sps:$4 sm:$0xff]  }
 0x231   :  { %v1526_v18 = vmax.f32 %v4217_v1, 0.0  ;;  %v4904_v61 = vld [vmem:[#allocation8 + $0x3d0] ss:$24 sps:$4 sm:$0xff]   ;;  %v4912_v63 = vld [vmem:[#allocation8 + $0x434] ss:$24 sps:$4 sm:$0xff]  }
 0x232   :  { %v5297_v12 = vpack.c.bf16 %v1525_v6, %v1525_v6  ;;  %v4915_v0 = vld [vmem:[#allocation8 + $0x464] ss:$24 sps:$4 sm:$0xff]   ;;  %v4913_v1 = vld [vmem:[#allocation8 + $0x460] ss:$24 sps:$4 sm:$0xff]   ;;  %v4918_v2 = vld [vmem:[#allocation8 + $0x494] ss:$24 sps:$4 sm:$0xff]  }
 0x233   :  { %v5295_v9 = vpack.c.bf16 %v1526_v18, %v1526_v18  ;;  %3406 = vmatpush1.bf16.msra.mxu1 %v4838_v3  ;;  %3529 = vmatpush1.bf16.msra.mxu0 %v4841_v4  ;;  %v4916_v3 = vld [vmem:[#allocation8 + $0x490] ss:$24 sps:$4 sm:$0xff]   ;;  %v4921_v4 = vld [vmem:[#allocation8 + $0x4c4] ss:$24 sps:$4 sm:$0xff]   ;;  %v4919_v6 = vld [vmem:[#allocation8 + $0x4c0] ss:$24 sps:$4 sm:$0xff]  }
 0x234   :  { %3539 = vmatprep.subr.bf16.mxu1 %v4846_v8  ;;  %v4924_v7 = vld [vmem:[#allocation8 + $0x4f4] ss:$24 sps:$4 sm:$0xff]   ;;  %v4922_v8 = vld [vmem:[#allocation8 + $0x4f0] ss:$24 sps:$4 sm:$0xff]   ;;  %v4927_v18 = vld [vmem:[#allocation8 + $0x524] ss:$24 sps:$4 sm:$0xff]  }
 0x235   :  { %3407 = vmatprep.mubr.bf16.mxu1 %v5295_v9  ;;  %3530 = vmatprep.mubr.bf16.mxu0 %v5295_v9 }
 0x236   :  { %3408 = vmatmul.mubr.bf16.vlgmr.msra.gmra.mrb[4].mxu1 %v5297_v12  ;;  %3531 = vmatmul.mubr.bf16.vlgmr.msra.gmra.mrb[8].mxu0 %v5297_v12 }
 0x237   :  { %3540 = vmatpush1.bf16.msra.mxu1 %v4844_v11  ;;  %3571 = vmatprep.mubr.bf16.mxu1 %v5266_v36  ;;  %v4862_v36 = vld [vmem:[#allocation8 + $0x130] ss:$24 sps:$4 sm:$0xff]   ;;  %v4925_v11 = vld [vmem:[#allocation8 + $0x520] ss:$24 sps:$4 sm:$0xff]  }
 0x238   :  { %3541 = vmatprep.subr.bf16.mxu1 %v4849_v13  ;;  %v4930_v13 = vld [vmem:[#allocation8 + $0x554] ss:$24 sps:$4 sm:$0xff]  }
 0x23b   :  { %3542 = vmatpush1.bf16.msra.mxu1 %v4847_v14  ;;  %v4928_v14 = vld [vmem:[#allocation8 + $0x550] ss:$24 sps:$4 sm:$0xff]  }
 0x23c   :  { %3543 = vmatprep.subr.bf16.mxu1 %v4852_v15  ;;  %v4933_v15 = vld [vmem:[#allocation8 + $0x584] ss:$24 sps:$4 sm:$0xff]  }
 0x23f   :  { %3544 = vmatpush1.bf16.msra.mxu1 %v4850_v5  ;;  %v4931_v5 = vld [vmem:[#allocation8 + $0x580] ss:$24 sps:$4 sm:$0xff]  }
 0x240   :  { %3545 = vmatprep.subr.bf16.mxu1 %v4855_v21  ;;  %v4936_v21 = vld [vmem:[#allocation8 + $0x5b4] ss:$24 sps:$4 sm:$0xff]  }
 0x243   :  { %3546 = vmatpush1.bf16.msra.mxu1 %v4853_v22  ;;  %v4934_v22 = vld [vmem:[#allocation8 + $0x5b0] ss:$24 sps:$4 sm:$0xff]  }
 0x244   :  { %3547 = vmatprep.subr.bf16.mxu1 %v4858_v33  ;;  %v4939_v33 = vld [vmem:[#allocation8 + $0x5e4] ss:$24 sps:$4 sm:$0xff]  }
 0x247   :  { %3548 = vmatpush1.bf16.msra.mxu1 %v4856_v24  ;;  %v4937_v24 = vld [vmem:[#allocation8 + $0x5e0] ss:$24 sps:$4 sm:$0xff]  }
 0x248   :  { %3549 = vmatprep.subr.bf16.mxu1 %v4861_v25  ;;  %v4942_v25 = vld [vmem:[#allocation8 + $0x614] ss:$24 sps:$4 sm:$0xff]  }
 0x24b   :  { %3550 = vmatpush1.bf16.msra.mxu1 %v4859_v48  ;;  %v4940_v48 = vld [vmem:[#allocation8 + $0x610] ss:$24 sps:$4 sm:$0xff]  }
 0x24c   :  { %3551 = vmatprep.subr.bf16.mxu1 %v4864_v26  ;;  %v4945_v26 = vld [vmem:[#allocation8 + $0x644] ss:$24 sps:$4 sm:$0xff]  }
 0x24f   :  { %3552 = vmatpush1.bf16.msra.mxu1 %v4862_v36  ;;  %v4943_v36 = vld [vmem:[#allocation8 + $0x640] ss:$24 sps:$4 sm:$0xff]  }
 0x250   :  { %3553 = vmatprep.subr.bf16.mxu1 %v4867_v27  ;;  %v4948_v27 = vld [vmem:[#allocation8 + $0x674] ss:$24 sps:$4 sm:$0xff]  }
 0x253   :  { %3554 = vmatpush1.bf16.msra.mxu1 %v4865_v28  ;;  %v4946_v28 = vld [vmem:[#allocation8 + $0x670] ss:$24 sps:$4 sm:$0xff]  }
 0x254   :  { %3555 = vmatprep.subr.bf16.mxu1 %v4870_v29  ;;  %v4951_v29 = vld [vmem:[#allocation8 + $0x6a4] ss:$24 sps:$4 sm:$0xff]  }
 0x257   :  { %3556 = vmatpush1.bf16.msra.mxu1 %v4868_v31  ;;  %v4949_v31 = vld [vmem:[#allocation8 + $0x6a0] ss:$24 sps:$4 sm:$0xff]  }
 0x258   :  { %3557 = vmatprep.subr.bf16.mxu1 %v4873_v32  ;;  %v4954_v32 = vld [vmem:[#allocation8 + $0x6d4] ss:$24 sps:$4 sm:$0xff]  }
 0x25b   :  { %3558 = vmatpush1.bf16.msra.mxu1 %v4871_v34  ;;  %v4952_v34 = vld [vmem:[#allocation8 + $0x6d0] ss:$24 sps:$4 sm:$0xff]  }
 0x25c   :  { %3559 = vmatprep.subr.bf16.mxu1 %v4876_v35  ;;  %v4957_v35 = vld [vmem:[#allocation8 + $0x704] ss:$24 sps:$4 sm:$0xff]  }
 0x25f   :  { %3560 = vmatpush1.bf16.msra.mxu1 %v4874_v37  ;;  %v4960_v37 = vld [vmem:[#allocation8 + $0x734] ss:$24 sps:$4 sm:$0xff]  }
 0x260   :  { %3561 = vmatprep.subr.bf16.mxu1 %v4879_v38  ;;  %v4963_v38 = vld [vmem:[#allocation8 + $0x764] ss:$24 sps:$4 sm:$0xff]  }
 0x263   :  { %3562 = vmatpush1.bf16.msra.mxu1 %v4877_v40  ;;  %v4961_v40 = vld [vmem:[#allocation8 + $0x760] ss:$24 sps:$4 sm:$0xff]  }
 0x264   :  { %3563 = vmatprep.subr.bf16.mxu1 %v4882_v41  ;;  %v4966_v41 = vld [vmem:[#allocation8 + $0x794] ss:$24 sps:$4 sm:$0xff]  }
 0x267   :  { %3564 = vmatpush1.bf16.msra.mxu1 %v4880_v43  ;;  %v4964_v43 = vld [vmem:[#allocation8 + $0x790] ss:$24 sps:$4 sm:$0xff]  }
 0x268   :  { %3565 = vmatprep.subr.bf16.mxu1 %v4885_v44  ;;  %v4969_v44 = vld [vmem:[#allocation8 + $0x7c4] ss:$24 sps:$4 sm:$0xff]  }
 0x26b   :  { %3566 = vmatpush1.bf16.msra.mxu1 %v4883_v45  ;;  %v4967_v45 = vld [vmem:[#allocation8 + $0x7c0] ss:$24 sps:$4 sm:$0xff]  }
 0x26c   :  { %3567 = vmatprep.subr.bf16.mxu1 %v4888_v46  ;;  %v4972_v46 = vld [vmem:[#allocation8 + $0x7f4] ss:$24 sps:$4 sm:$0xff]  }
 0x26f   :  { %3568 = vmatpush1.bf16.msra.mxu1 %v4886_v47  ;;  %v4970_v47 = vld [vmem:[#allocation8 + $0x7f0] ss:$24 sps:$4 sm:$0xff]  }
 0x270   :  { %3569 = vmatprep.subr.bf16.mxu1 %v4891_v49  ;;  %v4975_v49 = vld [vmem:[#allocation8 + $0x824] ss:$24 sps:$4 sm:$0xff]  }
 0x273   :  { %3570 = vmatpush1.bf16.msra.mxu1 %v4889_v50  ;;  %v4973_v50 = vld [vmem:[#allocation8 + $0x820] ss:$24 sps:$4 sm:$0xff]  }
 0x274   :  { %3580 = vmatprep.subr.bf16.mxu1 %v4894_v52  ;;  %v4978_v52 = vld [vmem:[#allocation8 + $0x854] ss:$24 sps:$4 sm:$0xff]  }
 0x276   :  { %3572 = vmatmul.mubr.bf16.vlgmr.msra.gmra.mrb[8].mxu1 %v5268_v39  ;;  %v4907_v39 = vld [vmem:[#allocation8 + $0x400] ss:$24 sps:$4 sm:$0xff]  }
 0x277   :  { %3581 = vmatpush1.bf16.msra.mxu1 %v4892_v53  ;;  %3612 = vmatprep.mubr.bf16.mxu1 %v5272_v42  ;;  %v4910_v42 = vld [vmem:[#allocation8 + $0x430] ss:$24 sps:$4 sm:$0xff]  }
 0x278   :  { %3582 = vmatprep.subr.bf16.mxu1 %v4897_v23  ;;  %v4976_v53 = vld [vmem:[#allocation8 + $0x850] ss:$24 sps:$4 sm:$0xff]   ;;  %v4981_v23 = vld [vmem:[#allocation8 + $0x884] ss:$24 sps:$4 sm:$0xff]  }
 0x27b   :  { %3583 = vmatpush1.bf16.msra.mxu1 %v4895_v56  ;;  %v4979_v56 = vld [vmem:[#allocation8 + $0x880] ss:$24 sps:$4 sm:$0xff]  }
 0x27c   :  { %3584 = vmatprep.subr.bf16.mxu1 %v4900_v10  ;;  %v4984_v10 = vld [vmem:[#allocation8 + $0x8b4] ss:$24 sps:$4 sm:$0xff]  }
 0x27f   :  { %3585 = vmatpush1.bf16.msra.mxu1 %v4898_v57  ;;  %v4982_v57 = vld [vmem:[#allocation8 + $0x8b0] ss:$24 sps:$4 sm:$0xff]  }
 0x280   :  { %3586 = vmatprep.subr.bf16.mxu1 %v4903_v58  ;;  %v4987_v58 = vld [vmem:[#allocation8 + $0x8e4] ss:$24 sps:$4 sm:$0xff]  }
 0x283   :  { %3587 = vmatpush1.bf16.msra.mxu1 %v4901_v59  ;;  %v4985_v59 = vld [vmem:[#allocation8 + $0x8e0] ss:$24 sps:$4 sm:$0xff]  }
 0x284   :  { %3588 = vmatprep.subr.bf16.mxu1 %v4906_v60 }
 0x287   :  { %3589 = vmatpush1.bf16.msra.mxu1 %v4904_v61 }
 0x288   :  { %3590 = vmatprep.subr.bf16.mxu1 %v4909_v62 }
 0x28b   :  { %3591 = vmatpush1.bf16.msra.mxu1 %v4907_v39 }
 0x28c   :  { %3592 = vmatprep.subr.bf16.mxu1 %v4912_v63 }
 0x28f   :  { %3593 = vmatpush1.bf16.msra.mxu1 %v4910_v42 }
 0x290   :  { %3594 = vmatprep.subr.bf16.mxu1 %v4915_v0 }
 0x293   :  { %3595 = vmatpush1.bf16.msra.mxu1 %v4913_v1 }
 0x294   :  { %3596 = vmatprep.subr.bf16.mxu1 %v4918_v2  ;;  %v1821_v2 = vld [vmem:[#allocation10] sm:$0x3f] }
 0x297   :  { %3597 = vmatpush1.bf16.msra.mxu1 %v4916_v3  ;;  %v1826_v3 = vrot.slane %v1821_v2, %v287_v17  ;;  %v1842_v17 = vrot.slane %v1821_v2, %v303_v51 }
 0x298   :  { %3598 = vmatprep.subr.bf16.mxu1 %v4921_v4  ;;  %v1830_v4 = vrot.slane %v1821_v2, %v291_v19  ;;  %v1846_v19 = vrot.slane %v1821_v2, %v307_v54 }
 0x29b   :  { %3599 = vmatpush1.bf16.msra.mxu1 %v4919_v6 }
 0x29c   :  { %3600 = vmatprep.subr.bf16.mxu1 %v4924_v7 }
 0x29f   :  { %3601 = vmatpush1.bf16.msra.mxu1 %v4922_v8 }
 0x2a0   :  { %3602 = vmatprep.subr.bf16.mxu1 %v4927_v18 }
 0x2a3   :  { %3603 = vmatpush1.bf16.msra.mxu1 %v4925_v11 }
 0x2a4   :  { %3604 = vmatprep.subr.bf16.mxu1 %v4930_v13  ;;  %v1838_v13 = vrot.slane %v1821_v2, %v299_v20 }
 0x2a7   :  { %3605 = vmatpush1.bf16.msra.mxu1 %v4928_v14 }
 0x2a8   :  { %3606 = vmatprep.subr.bf16.mxu1 %v4933_v15 }
 0x2ab   :  { %3607 = vmatpush1.bf16.msra.mxu1 %v4931_v5 }
 0x2ac   :  { %3608 = vmatprep.subr.bf16.mxu1 %v4936_v21 }
 0x2af   :  { %3609 = vmatpush1.bf16.msra.mxu1 %v4934_v22 }
 0x2b0   :  { %3610 = vmatprep.subr.bf16.mxu1 %v4939_v33 }
 0x2b3   :  { %3611 = vmatpush1.bf16.msra.mxu1 %v4937_v24 }
 0x2b4   :  { %3621 = vmatprep.subr.bf16.mxu1 %v4942_v25 }
 0x2b6   :  { %3613 = vmatmul.mubr.bf16.vlgmr.msra.gmra.mrb[8].mxu1 %v5283_v55  ;;  %v4955_v55 = vld [vmem:[#allocation8 + $0x700] ss:$24 sps:$4 sm:$0xff]  }
 0x2b7   :  { %3622 = vmatpush1.bf16.msra.mxu1 %v4940_v48  ;;  %3653 = vmatprep.mubr.bf16.mxu1 %v5295_v9  ;;  %v4958_v9 = vld [vmem:[#allocation8 + $0x730] ss:$24 sps:$4 sm:$0xff]  }
 0x2b8   :  { %3623 = vmatprep.subr.bf16.mxu1 %v4945_v26 }
 0x2bb   :  { %3624 = vmatpush1.bf16.msra.mxu1 %v4943_v36 }
 0x2bc   :  { %3625 = vmatprep.subr.bf16.mxu1 %v4948_v27 }
 0x2bf   :  { %3626 = vmatpush1.bf16.msra.mxu1 %v4946_v28 }
 0x2c0   :  { %3627 = vmatprep.subr.bf16.mxu1 %v4951_v29 }
 0x2c3   :  { %3628 = vmatpush1.bf16.msra.mxu1 %v4949_v31 }
 0x2c4   :  { %3629 = vmatprep.subr.bf16.mxu1 %v4954_v32 }
 0x2c7   :  { %3630 = vmatpush1.bf16.msra.mxu1 %v4952_v34 }
 0x2c8   :  { %3631 = vmatprep.subr.bf16.mxu1 %v4957_v35 }
 0x2cb   :  { %3632 = vmatpush1.bf16.msra.mxu1 %v4955_v55 }
 0x2cc   :  { %3633 = vmatprep.subr.bf16.mxu1 %v4960_v37 }
 0x2cf   :  { %3634 = vmatpush1.bf16.msra.mxu1 %v4958_v9 }
 0x2d0   :  { %3635 = vmatprep.subr.bf16.mxu1 %v4963_v38 }
 0x2d3   :  { %3636 = vmatpush1.bf16.msra.mxu1 %v4961_v40 }
 0x2d4   :  { %3637 = vmatprep.subr.bf16.mxu1 %v4966_v41 }
 0x2d7   :  { %3638 = vmatpush1.bf16.msra.mxu1 %v4964_v43 }
 0x2d8   :  { %3639 = vmatprep.subr.bf16.mxu1 %v4969_v44 }
 0x2db   :  { %3640 = vmatpush1.bf16.msra.mxu1 %v4967_v45 }
 0x2dc   :  { %3641 = vmatprep.subr.bf16.mxu1 %v4972_v46 }
 0x2df   :  { %3642 = vmatpush1.bf16.msra.mxu1 %v4970_v47 }
 0x2e0   :  { %3643 = vmatprep.subr.bf16.mxu1 %v4975_v49 }
 0x2e3   :  { %3644 = vmatpush1.bf16.msra.mxu1 %v4973_v50 }
 0x2e4   :  { %3645 = vmatprep.subr.bf16.mxu1 %v4978_v52 }
 0x2e7   :  { %3646 = vmatpush1.bf16.msra.mxu1 %v4976_v53 }
 0x2e8   :  { %3647 = vmatprep.subr.bf16.mxu1 %v4981_v23 }
 0x2eb   :  { %3648 = vmatpush1.bf16.msra.mxu1 %v4979_v56 }
 0x2ec   :  { %3649 = vmatprep.subr.bf16.mxu1 %v4984_v10 }
 0x2ef   :  { %3650 = vmatpush1.bf16.msra.mxu1 %v4982_v57 }
 0x2f0   :  { %3651 = vmatprep.subr.bf16.mxu1 %v4987_v58 }
 0x2f3   :  { %3652 = vmatpush1.bf16.msra.mxu1 %v4985_v59 }
 0x2f6   :  { %3654 = vmatmul.mubr.bf16.vlgmr.msra.gmra.mrb[8].mxu1 %v5297_v12  ;;  %v1834_v12 = vrot.slane %v1821_v2, %v295_v30 }
 0x309   :  { %v3409_v60 = vpop.f32.mrb[4].mxu1  ;;  %v3532_v61 = vpop.f32.mrb[8].mxu0 }
 0x30a   :  { %v3411_v62 = vpop.f32.mrb[5].mxu1  ;;  %v3534_v39 = vpop.f32.mrb[9].mxu0  ;;  %v4218_v6 = vadd.f32 %v3409_v60, %v1826_v3  ;;  %v4220_v11 = vadd.f32 %v3532_v61, %v1834_v12 }
 0x30b   :  { %v3413_v63 = vpop.f32.mrb[6].mxu1  ;;  %v3536_v42 = vpop.f32.mrb[10].mxu0  ;;  %v4219_v7 = vadd.f32 %v3411_v62, %v1830_v4  ;;  %v4221_v5 = vadd.f32 %v3534_v39, %v1838_v13 }
 0x30c   :  { %v3414_v0 = vpop.f32.mrb[7].mxu1  ;;  %v3537_v1 = vpop.f32.mrb[11].mxu0  ;;  %v3662_v8 = vmul.f32 %v4218_v6, %v4218_v6  ;;  %v3664_v15 = vmul.f32 %v4220_v11, %v4220_v11 }
 0x30d   :  { %v3663_v18 = vmul.f32 %v4219_v7, %v4219_v7  ;;  %v3665_v33 = vmul.f32 %v4221_v5, %v4221_v5 }
 0x30f   :  { %v3668_v14 = vadd.f32 %v3663_v18, %v3662_v8 }
 0x311   :  { %v3669_v21 = vadd.f32 %v3668_v14, %v3664_v15 }
 0x313   :  { %v3670_v27 = vadd.f32 %v3669_v21, %v3665_v33 }
 0x3c9   :  { %v3655_v22 = vpop.f32.mrb[8].mxu1 }
 0x3ca   :  { %v4222_v24 = vadd.f32 %v3655_v22, %v1842_v17  ;;  %v3657_v30 = vpop.f32.mrb[9].mxu1 }
 0x3cb   :  { %v4223_v25 = vadd.f32 %v3657_v30, %v1846_v19  ;;  %v3659_v48 = vpop.f32.mrb[10].mxu1 }
 0x3cc   :  { %v3666_v26 = vmul.f32 %v4222_v24, %v4222_v24  ;;  %v3660_v36 = vpop.f32.mrb[11].mxu1 }
 0x3cd   :  { %v3667_v20 = vmul.f32 %v4223_v25, %v4223_v25 }
 0x3ce   :  { %v3671_v28 = vadd.f32 %v3670_v27, %v3666_v26 }
 0x3d0   :  { %v3672_v29 = vadd.f32 %v3671_v28, %v3667_v20 }
 0x3d2   :  { %3673 = vadd.xlane.f32.xlu0 %v3672_v29 }
 0x45f   :  { %v3674_v31 = vpop.xlane.xlu0 %3673 }
 0x460   :  { %4988 = vrsqrt.f32 %v3674_v31 }
 0x46a   :  { %v4989_v51 = vpop.eup %4988 }
 0x46b   :  { %v3676_v32 = vmul.f32 %v4989_v51, %v4218_v6  ;;  %v3677_v16 = vmul.f32 %v4989_v51, %v4219_v7  ;;  %v3678_v54 = vmul.f32 %v4989_v51, %v4220_v11  ;;  %v3679_v34 = vmul.f32 %v4989_v51, %v4221_v5 }
 0x46c   :  { %v3680_v35 = vmul.f32 %v4989_v51, %v4222_v24  ;;  %v3681_v55 = vmul.f32 %v4989_v51, %v4223_v25 }
 0x46d   :  { %v4209_v37 = vpack.c.bf16 %v3677_v16, %v3676_v32  ;;  %v4210_v9 = vpack.c.bf16 %v3679_v34, %v3678_v54 }
 0x46e   :  { %v4211_v38 = vpack.c.bf16 %v3681_v55, %v3680_v35 }
 0x46f   :  { %3706 = vst [vmem:[#allocation11] sm:$0xff] %v4209_v37  ;;  %3707 = vst [vmem:[#allocation11 + $0x8] sm:$0xff] %v4210_v9 }
 0x470   :  { %3708 = vst [vmem:[#allocation11 + $0x10] sm:$0xff] %v4211_v38 }
 0x471   :  { %5111 = shalt.err (!%p5108_p2)
}
 0x472   :  { %s5112_s28 = scalar_lea.hbm %s5338_s5, 384 }
 0x473   :  { %p5113_p3 = scmp.ne.s32.totalorder %s5338_s5, %s5112_s28  ;;  %p5116_p4 = scmp.lt.u32.totalorder %s5112_s28, %s5338_s5 }
 0x475   :  { %p5118_p5 = pnand %p5116_p4, %p5113_p3 }
 0x477   :  { %5121 = shalt.err (!%p5118_p5)
}
 0x478   :  { %3718 = dma.vmem_to_hbm [thread:$0]  %s3716_s25, 384, %s5338_s5, [#allocation4]  }
 0x479   :  { %5128 = dma.done.wait [#allocation4], 384  }
 0x47a   :  { %5129 = vsyncadd [#allocation4], 4294966912 }
 0x47b   :  { %3722 = vsyncpa [#allocation3], 1 }
 0x47c   :  { %3723 = vsyncpa [#allocation6], 1 }
 0x47d   :  { %3724 = vsyncpa [#allocation9], 1 }
 0x47e   :  { %3725 = vsyncpa [#allocation4], 1 }

</bundles_post_ra>
